<compile_context>
chip_gen: v6e
topology: v6e:2x2x1
jax: 0.10.0
libtpu: 0.0.40
codegen_flags: <defaults>
</compile_context>

<pallas_src>
import jax
import jax.numpy as jnp
from jax.experimental import pallas as pl
from jax.experimental.pallas import tpu as pltpu


def _decoder_attn_kernel(
    x_ref,    # (S*Bt, H) f32   time-major inputs (row = t*Bt + b)
    h0_ref,   # (Bt, H)   f32   initial hidden (last GRU layer)
    awx_ref,  # (H, H)    bf16  Attn.W acting on inputs  (pre-transposed)
    awh_ref,  # (H, H)    bf16  Attn.W acting on hidden  (pre-transposed)
    awb_ref,  # (1, H)    f32   Attn.W bias
    avv_ref,  # (1, H)    f32   row-sum of Attn.V weight (pre-transposed)
    wi_ref,   # (H, 3H)   bf16  GRU W_ih fused [r|z|n]   (pre-transposed)
    wh_ref,   # (H, 3H)   bf16  GRU W_hh fused [r|z|n]   (pre-transposed)
    bi_ref,   # (1, 3H)   f32   GRU b_ih fused
    bh_ref,   # (1, 3H)   f32   GRU b_hh fused
    out_ref,  # (S*Bt, H) f32   GRU outputs, time-major
    hn_ref,   # (Bt, H)   f32   final hidden
):
    Bt, H = h0_ref.shape
    S = x_ref.shape[0] // Bt
    bf16 = jnp.bfloat16

    x = x_ref[...]                                   # (S*Bt, H) f32
    h0 = h0_ref[...]                                 # (Bt, H)   f32

    # ---------------- Attn (Bahdanau soft attention, no mask) ----------------
    # W([inputs ; hidden]) == inputs @ Wx + hidden @ Wh + b.  Input side is one
    # batched (S*Bt, H) matmul; hidden side is (Bt, H), tiled over time in one
    # op (time-major layout => a single block-tile, no per-row concatenation).
    pre_x = jnp.dot(x.astype(bf16), awx_ref[...],
                    preferred_element_type=jnp.float32)                # (S*Bt, H)
    h_w = jnp.dot(h0.astype(bf16), awh_ref[...],
                  preferred_element_type=jnp.float32) + awb_ref[...]   # (Bt, H)
    t = jnp.tanh(pre_x + jnp.tile(h_w, (S, 1)))                        # (S*Bt, H)

    # sum(V(t), dim=-1) == t @ rowsum(V.weight.T) + sum(V.bias); the constant
    # bias sum is softmax-invariant and dropped on the host.
    scores = jnp.sum(t * avv_ref[...], axis=1, keepdims=True)          # (S*Bt, 1)

    # Per-batch-row softmax over the sequence, vectorized across the batch
    # tile: exp / divide run once on the whole column; the per-batch max / sum
    # reductions are a short static pass over contiguous time slices.
    m = scores[0:Bt, :]
    for tt in range(1, S):
        m = jnp.maximum(m, scores[tt * Bt:(tt + 1) * Bt, :])           # (Bt, 1)
    p = jnp.exp(scores - jnp.tile(m, (S, 1)))                          # (S*Bt, 1)
    l = p[0:Bt, :]
    for tt in range(1, S):
        l = l + p[tt * Bt:(tt + 1) * Bt, :]                            # (Bt, 1)
    alpha = p / jnp.tile(l, (S, 1))          # exact softmax weights   (S*Bt, 1)
    att = alpha * x                                                    # (S*Bt, H)

    # ---------------- GRU (single layer, batch_first) ----------------
    # Hoist all input-side gate matmuls out of the recurrence: one (S*Bt, 3H)
    # matmul (bias folded in once instead of per timestep).
    gi = jnp.dot(att.astype(bf16), wi_ref[...],
                 preferred_element_type=jnp.float32) + bi_ref[...]     # (S*Bt, 3H)

    wh = wh_ref[...]                         # loop-invariant weight / bias reads
    bh = bh_ref[...]                         # (hoisted off the serial chain)

    h = h0
    for tt in range(S):                      # static S -> fully unrolled
        gi_t = gi[tt * Bt:(tt + 1) * Bt, :]  # contiguous static slice (Bt, 3H)
        gh = jnp.dot(h.astype(bf16), wh,
                     preferred_element_type=jnp.float32) + bh          # (Bt, 3H)
        r = jax.nn.sigmoid(gi_t[:, 0:H] + gh[:, 0:H])
        z = jax.nn.sigmoid(gi_t[:, H:2 * H] + gh[:, H:2 * H])
        n = jnp.tanh(gi_t[:, 2 * H:] + r * gh[:, 2 * H:])
        h = (1.0 - z) * n + z * h
        # store this step's hidden straight into its output rows (off the
        # serial dependency chain; keeps live ranges bounded for large S)
        out_ref[tt * Bt:(tt + 1) * Bt, :] = h.astype(out_ref.dtype)

    hn_ref[...] = h.astype(hn_ref.dtype)


def _choose_batch_tile(B):
    """Pick the batch tile Bt (a divisor of B).

    Goals:
      * Bt is sublane-friendly: a multiple of 8, or the whole batch (so every
        BlockSpec second-to-last dim is 8-aligned or equals the full dim).
      * Large enough to fill MXU rows in the serial per-timestep matmul
        (capped at 256, the v6e/v7x MXU height).
      * Prefer >= 2 grid steps when B allows, so auto-pipelining overlaps DMA
        with compute and v7x can shard batch tiles across both TensorCores.
    """
    divisors = [d for d in range(1, B + 1) if B % d == 0]
    valid = sorted({d for d in divisors if d % 8 == 0} | {B})
    capped = [d for d in valid if d <= 256] or [min(valid)]
    bt = max(capped)
    if bt == B and B > 1:
        smaller = [d for d in capped if d < B and d >= 8]
        if smaller:                          # keep tiles MXU-friendly when splitting
            bt = max(smaller)
    return bt


@jax.jit
def decoder_attn_forward(x, hidden_states, params):
    """x: (B, S, H) float, hidden_states: (num_layers, B, H).  Returns (out, h_n).

    The PyTorch module always builds a single-layer GRU (nn.GRU without a
    num_layers override), so only a (1, B, H) hidden state is valid there;
    the attention uses hidden_states[-1], which coincides with that layer.
    """
    B, S, H = x.shape
    h_last = hidden_states[-1]                       # (B, H) — last (only) layer

    Bt = _choose_batch_tile(B)
    ngrid = B // Bt

    # Time-major within each batch tile: row = t*Bt + b.  One XLA transpose
    # each way; keeps every in-kernel per-timestep access a contiguous slice.
    x_tm = (x.reshape(ngrid, Bt, S, H)
             .transpose(0, 2, 1, 3)
             .reshape(ngrid * S * Bt, H))

    out_tm, hn = pl.pallas_call(
        _decoder_attn_kernel,
        out_shape=(
            jax.ShapeDtypeStruct((ngrid * S * Bt, H), jnp.float32),
            jax.ShapeDtypeStruct((B, H), jnp.float32),
        ),
        grid_spec=pltpu.PrefetchScalarGridSpec(
            num_scalar_prefetch=0,
            grid=(ngrid,),
            in_specs=[
                pl.BlockSpec((S * Bt, H), lambda i: (i, 0)),      # inputs (time-major)
                pl.BlockSpec((Bt, H), lambda i: (i, 0)),          # h0
                pl.BlockSpec((H, H), lambda i: (0, 0)),           # attn Wx (bf16)
                pl.BlockSpec((H, H), lambda i: (0, 0)),           # attn Wh (bf16)
                pl.BlockSpec((1, H), lambda i: (0, 0)),           # attn W bias
                pl.BlockSpec((1, H), lambda i: (0, 0)),           # attn V row-sum
                pl.BlockSpec((H, 3 * H), lambda i: (0, 0)),       # GRU W_ih fused (bf16)
                pl.BlockSpec((H, 3 * H), lambda i: (0, 0)),       # GRU W_hh fused (bf16)
                pl.BlockSpec((1, 3 * H), lambda i: (0, 0)),       # GRU b_ih fused
                pl.BlockSpec((1, 3 * H), lambda i: (0, 0)),       # GRU b_hh fused
            ],
            out_specs=[
                pl.BlockSpec((S * Bt, H), lambda i: (i, 0)),
                pl.BlockSpec((Bt, H), lambda i: (i, 0)),
            ],
        ),
        # Batch tiles are independent; on v7x this lets the two TensorCores
        # split the grid.  (For very large H, additionally single-buffer the
        # constant-weight BlockSpecs and set vmem_limit_bytes explicitly to
        # fit v7x's 64 MiB VMEM — not needed at these demo shapes.)
        compiler_params=pltpu.CompilerParams(
            dimension_semantics=("parallel",)),
    )(
        x_tm, h_last,
        params["awx"], params["awh"], params["awb"], params["avv"],
        params["wi"], params["wh"], params["bi"], params["bh"],
    )

    out = (out_tm.reshape(ngrid, S, Bt, H)
                 .transpose(0, 2, 1, 3)
                 .reshape(B, S, H))
    # Match PyTorch nn.GRU return convention: (output, h_n), h_n (1, B, H).
    return out, hn.reshape(1, B, H)


def _make_params(key, H):
    """Deterministic init mirroring the PyTorch module's parameter shapes.

    Attn.W : Linear(2H -> H) -> split into (H,H) input-side and (H,H) hidden-side.
    Attn.V : Linear(H -> H)  -> only its weight row-sum is needed (scores use the
             row-sum of V(t); the bias row-sum is softmax-invariant and dropped).
    GRU    : weight_ih/weight_hh (3H, H), bias_ih/bias_hh (3H,), gate order [r,z,n],
             fused to (H, 3H) / (1, 3H), pre-transposed to (in, out).
    Matmul weights are stored in bfloat16 (f32 accumulation in the kernel).
    """
    ks = jax.random.split(key, 8)
    k_lin = 1.0 / jnp.sqrt(H)
    bf16 = jnp.bfloat16

    W_full = jax.random.uniform(ks[0], (H, 2 * H), jnp.float32, -k_lin, k_lin)  # torch (out,in)
    awx = W_full[:, :H].T.astype(bf16)            # (H, H) acts on inputs
    awh = W_full[:, H:].T.astype(bf16)            # (H, H) acts on hidden
    awb = jax.random.uniform(ks[1], (1, H), jnp.float32, -k_lin, k_lin)

    V_full = jax.random.uniform(ks[2], (H, H), jnp.float32, -k_lin, k_lin)      # torch (out,in)
    avv = V_full.T.sum(axis=1).reshape(1, H)      # f32 row-sum of V weight (pre-T)
    _ = jax.random.uniform(ks[3], (1, H), jnp.float32, -k_lin, k_lin)  # V bias (softmax-invariant)

    k_gru = 1.0 / jnp.sqrt(H)
    w_ih = jax.random.uniform(ks[4], (3 * H, H), jnp.float32, -k_gru, k_gru)    # torch layout
    w_hh = jax.random.uniform(ks[5], (3 * H, H), jnp.float32, -k_gru, k_gru)
    b_ih = jax.random.uniform(ks[6], (3 * H,), jnp.float32, -k_gru, k_gru)
    b_hh = jax.random.uniform(ks[7], (3 * H,), jnp.float32, -k_gru, k_gru)

    wi = w_ih.T.astype(bf16)                      # (H, 3H), columns [r|z|n]
    wh = w_hh.T.astype(bf16)                      # (H, 3H)
    bi = b_ih.reshape(1, 3 * H)
    bh = b_hh.reshape(1, 3 * H)

    return dict(awx=awx, awh=awh, awb=awb, avv=avv, wi=wi, wh=wh, bi=bi, bh=bh)


def _reference(x, hidden_states, p):
    """Pure-JAX reference of the PyTorch forward (dropout p=0, mask=None), using
    the same bf16 matmul operands / f32 accumulation as the kernel."""
    B, S, H = x.shape
    bf16 = jnp.bfloat16
    h_last = hidden_states[-1]                                        # (B, H)

    pre_x = jnp.dot(x.reshape(B * S, H).astype(bf16), p["awx"],
                    preferred_element_type=jnp.float32).reshape(B, S, H)
    h_w = jnp.dot(h_last.astype(bf16), p["awh"],
                  preferred_element_type=jnp.float32) + p["awb"]      # (B, H)
    t = jnp.tanh(pre_x + h_w[:, None, :])
    scores = jnp.sum(t * p["avv"], axis=2, keepdims=True)             # (B, S, 1)
    alpha = jax.nn.softmax(scores, axis=1)                            # exact softmax
    att = alpha * x                                                   # (B, S, H)

    gi = (jnp.dot(att.reshape(B * S, H).astype(bf16), p["wi"],
                  preferred_element_type=jnp.float32).reshape(B, S, 3 * H)
          + p["bi"])

    def step(h, gi_t):
        gh = jnp.dot(h.astype(bf16), p["wh"],
                     preferred_element_type=jnp.float32) + p["bh"]
        r = jax.nn.sigmoid(gi_t[:, 0:H] + gh[:, 0:H])
        z = jax.nn.sigmoid(gi_t[:, H:2 * H] + gh[:, H:2 * H])
        n = jnp.tanh(gi_t[:, 2 * H:] + r * gh[:, 2 * H:])
        h_new = (1.0 - z) * n + z * h
        return h_new, h_new

    hT, ys = jax.lax.scan(step, h_last, jnp.swapaxes(gi, 0, 1))
    return jnp.swapaxes(ys, 0, 1), hT.reshape(1, B, H)


if __name__ == "__main__":
    B, S, H = 2, 8, 32          # small shapes: batch=2, seq=8, hidden=32
    num_layers = 1

    key = jax.random.PRNGKey(0)
    k_x, k_h, k_p = jax.random.split(key, 3)
    x = jax.random.normal(k_x, (B, S, H), jnp.float32)                 # embedded inputs
    hidden_states = jax.random.normal(k_h, (num_layers, B, H), jnp.float32)
    params = _make_params(k_p, H)

    out, h_n = decoder_attn_forward(x, hidden_states, params)
    out = jax.block_until_ready(out)
    h_n = jax.block_until_ready(h_n)

    ref_out, ref_hn = _reference(x, hidden_states, params)
    assert out.shape == (B, S, H) and h_n.shape == (num_layers, B, H)
    # Tolerance covers MXU vs XLA accumulation order (bf16 operand rounding and
    # the exact softmax divide are identical in kernel and reference).
    assert jnp.allclose(out, ref_out, rtol=2e-3, atol=2e-3)
    assert jnp.allclose(h_n, ref_hn, rtol=2e-3, atol=2e-3)

    print("KERNEL_OK")
</pallas_src>

<mosaic_0001>
module attributes {stable_mosaic.version = 11 : i64} {
  func.func @_decoder_attn_kernel(%arg0: i32, %arg1: memref<16x32xf32, #tpu.memory_space<vmem>>, %arg2: memref<2x32xf32, #tpu.memory_space<vmem>>, %arg3: memref<32x32xbf16, #tpu.memory_space<vmem>>, %arg4: memref<32x32xbf16, #tpu.memory_space<vmem>>, %arg5: memref<1x32xf32, #tpu.memory_space<vmem>>, %arg6: memref<1x32xf32, #tpu.memory_space<vmem>>, %arg7: memref<32x96xbf16, #tpu.memory_space<vmem>>, %arg8: memref<32x96xbf16, #tpu.memory_space<vmem>>, %arg9: memref<1x96xf32, #tpu.memory_space<vmem>>, %arg10: memref<1x96xf32, #tpu.memory_space<vmem>>, %arg11: memref<16x32xf32, #tpu.memory_space<vmem>>, %arg12: memref<2x32xf32, #tpu.memory_space<vmem>>) attributes {dimension_semantics = [#tpu.dimension_semantics<parallel>], iteration_bounds = array<i64: 1>, scalar_prefetch = 0 : i64, scratch_operands = 0 : i64, tpu.core_type = #tpu.core_type<tc>, window_params = [{transform_indices = @transform_0, window_bounds = array<i64: 16, 32>}, {transform_indices = @transform_1, window_bounds = array<i64: 2, 32>}, {pipeline_mode = #tpu.pipeline_mode<synchronous>, transform_indices = @transform_2, window_bounds = array<i64: 32, 32>}, {pipeline_mode = #tpu.pipeline_mode<synchronous>, transform_indices = @transform_3, window_bounds = array<i64: 32, 32>}, {pipeline_mode = #tpu.pipeline_mode<synchronous>, transform_indices = @transform_4, window_bounds = array<i64: 1, 32>}, {pipeline_mode = #tpu.pipeline_mode<synchronous>, transform_indices = @transform_5, window_bounds = array<i64: 1, 32>}, {pipeline_mode = #tpu.pipeline_mode<synchronous>, transform_indices = @transform_6, window_bounds = array<i64: 32, 96>}, {pipeline_mode = #tpu.pipeline_mode<synchronous>, transform_indices = @transform_7, window_bounds = array<i64: 32, 96>}, {pipeline_mode = #tpu.pipeline_mode<synchronous>, transform_indices = @transform_8, window_bounds = array<i64: 1, 96>}, {pipeline_mode = #tpu.pipeline_mode<synchronous>, transform_indices = @transform_9, window_bounds = array<i64: 1, 96>}, {transform_indices = @transform_10, window_bounds = array<i64: 16, 32>}, {transform_indices = @transform_11, window_bounds = array<i64: 2, 32>}]} {
    %c0 = arith.constant 0 : index
    %c0_0 = arith.constant 0 : index
    %0 = vector.load %arg1[%c0, %c0_0] : memref<16x32xf32, #tpu.memory_space<vmem>>, vector<16x32xf32>
    %c0_1 = arith.constant 0 : index
    %c0_2 = arith.constant 0 : index
    %1 = vector.load %arg2[%c0_1, %c0_2] : memref<2x32xf32, #tpu.memory_space<vmem>>, vector<2x32xf32>
    %2 = arith.truncf %0 : vector<16x32xf32> to vector<16x32xbf16>
    %c0_3 = arith.constant 0 : index
    %c0_4 = arith.constant 0 : index
    %3 = vector.load %arg3[%c0_3, %c0_4] : memref<32x32xbf16, #tpu.memory_space<vmem>>, vector<32x32xbf16>
    %cst = arith.constant dense<0.000000e+00> : vector<16x32xf32>
    %4 = tpu.matmul %2, %3, %cst {dimension_numbers = #tpu.dot_dimension_numbers<[1], [0], [0], [1], [0, 0, 1, 1], [], []>} : vector<16x32xbf16>, vector<32x32xbf16>, vector<16x32xf32> -> vector<16x32xf32>
    %5 = arith.truncf %1 : vector<2x32xf32> to vector<2x32xbf16>
    %c0_5 = arith.constant 0 : index
    %c0_6 = arith.constant 0 : index
    %6 = vector.load %arg4[%c0_5, %c0_6] : memref<32x32xbf16, #tpu.memory_space<vmem>>, vector<32x32xbf16>
    %cst_7 = arith.constant dense<0.000000e+00> : vector<2x32xf32>
    %7 = tpu.matmul %5, %6, %cst_7 {dimension_numbers = #tpu.dot_dimension_numbers<[1], [0], [0], [1], [0, 0, 1, 1], [], []>} : vector<2x32xbf16>, vector<32x32xbf16>, vector<2x32xf32> -> vector<2x32xf32>
    %c0_8 = arith.constant 0 : index
    %c0_9 = arith.constant 0 : index
    %8 = vector.load %arg5[%c0_8, %c0_9] : memref<1x32xf32, #tpu.memory_space<vmem>>, vector<1x32xf32>
    %9 = vector.broadcast %8 : vector<1x32xf32> to vector<2x32xf32>
    %10 = arith.addf %7, %9 : vector<2x32xf32>
    %11 = tpu.concatenate %10, %10, %10, %10, %10, %10, %10, %10 in 0 : vector<2x32xf32>, vector<2x32xf32>, vector<2x32xf32>, vector<2x32xf32>, vector<2x32xf32>, vector<2x32xf32>, vector<2x32xf32>, vector<2x32xf32> -> vector<16x32xf32>
    %12 = arith.addf %4, %11 : vector<16x32xf32>
    %13 = math.tanh %12 : vector<16x32xf32>
    %c0_10 = arith.constant 0 : index
    %c0_11 = arith.constant 0 : index
    %14 = vector.load %arg6[%c0_10, %c0_11] : memref<1x32xf32, #tpu.memory_space<vmem>>, vector<1x32xf32>
    %15 = vector.broadcast %14 : vector<1x32xf32> to vector<16x32xf32>
    %16 = arith.mulf %13, %15 : vector<16x32xf32>
    %cst_12 = arith.constant dense<0.000000e+00> : vector<16xf32>
    %17 = vector.multi_reduction <add>, %16, %cst_12 [1] : vector<16x32xf32> to vector<16xf32>
    %18 = vector.shape_cast %17 : vector<16xf32> to vector<16x1xf32>
    %19 = vector.extract_strided_slice %18 {offsets = [0, 0], sizes = [2, 1], strides = [1, 1]} : vector<16x1xf32> to vector<2x1xf32>
    %20 = vector.extract_strided_slice %18 {offsets = [2, 0], sizes = [2, 1], strides = [1, 1]} : vector<16x1xf32> to vector<2x1xf32>
    %21 = arith.maximumf %19, %20 : vector<2x1xf32>
    %22 = vector.extract_strided_slice %18 {offsets = [4, 0], sizes = [2, 1], strides = [1, 1]} : vector<16x1xf32> to vector<2x1xf32>
    %23 = arith.maximumf %21, %22 : vector<2x1xf32>
    %24 = vector.extract_strided_slice %18 {offsets = [6, 0], sizes = [2, 1], strides = [1, 1]} : vector<16x1xf32> to vector<2x1xf32>
    %25 = arith.maximumf %23, %24 : vector<2x1xf32>
    %26 = vector.extract_strided_slice %18 {offsets = [8, 0], sizes = [2, 1], strides = [1, 1]} : vector<16x1xf32> to vector<2x1xf32>
    %27 = arith.maximumf %25, %26 : vector<2x1xf32>
    %28 = vector.extract_strided_slice %18 {offsets = [10, 0], sizes = [2, 1], strides = [1, 1]} : vector<16x1xf32> to vector<2x1xf32>
    %29 = arith.maximumf %27, %28 : vector<2x1xf32>
    %30 = vector.extract_strided_slice %18 {offsets = [12, 0], sizes = [2, 1], strides = [1, 1]} : vector<16x1xf32> to vector<2x1xf32>
    %31 = arith.maximumf %29, %30 : vector<2x1xf32>
    %32 = vector.extract_strided_slice %18 {offsets = [14, 0], sizes = [2, 1], strides = [1, 1]} : vector<16x1xf32> to vector<2x1xf32>
    %33 = arith.maximumf %31, %32 : vector<2x1xf32>
    %34 = tpu.concatenate %33, %33, %33, %33, %33, %33, %33, %33 in 0 : vector<2x1xf32>, vector<2x1xf32>, vector<2x1xf32>, vector<2x1xf32>, vector<2x1xf32>, vector<2x1xf32>, vector<2x1xf32>, vector<2x1xf32> -> vector<16x1xf32>
    %35 = arith.subf %18, %34 : vector<16x1xf32>
    %36 = math.exp %35 : vector<16x1xf32>
    %37 = vector.extract_strided_slice %36 {offsets = [0, 0], sizes = [2, 1], strides = [1, 1]} : vector<16x1xf32> to vector<2x1xf32>
    %38 = vector.extract_strided_slice %36 {offsets = [2, 0], sizes = [2, 1], strides = [1, 1]} : vector<16x1xf32> to vector<2x1xf32>
    %39 = arith.addf %37, %38 : vector<2x1xf32>
    %40 = vector.extract_strided_slice %36 {offsets = [4, 0], sizes = [2, 1], strides = [1, 1]} : vector<16x1xf32> to vector<2x1xf32>
    %41 = arith.addf %39, %40 : vector<2x1xf32>
    %42 = vector.extract_strided_slice %36 {offsets = [6, 0], sizes = [2, 1], strides = [1, 1]} : vector<16x1xf32> to vector<2x1xf32>
    %43 = arith.addf %41, %42 : vector<2x1xf32>
    %44 = vector.extract_strided_slice %36 {offsets = [8, 0], sizes = [2, 1], strides = [1, 1]} : vector<16x1xf32> to vector<2x1xf32>
    %45 = arith.addf %43, %44 : vector<2x1xf32>
    %46 = vector.extract_strided_slice %36 {offsets = [10, 0], sizes = [2, 1], strides = [1, 1]} : vector<16x1xf32> to vector<2x1xf32>
    %47 = arith.addf %45, %46 : vector<2x1xf32>
    %48 = vector.extract_strided_slice %36 {offsets = [12, 0], sizes = [2, 1], strides = [1, 1]} : vector<16x1xf32> to vector<2x1xf32>
    %49 = arith.addf %47, %48 : vector<2x1xf32>
    %50 = vector.extract_strided_slice %36 {offsets = [14, 0], sizes = [2, 1], strides = [1, 1]} : vector<16x1xf32> to vector<2x1xf32>
    %51 = arith.addf %49, %50 : vector<2x1xf32>
    %52 = tpu.concatenate %51, %51, %51, %51, %51, %51, %51, %51 in 0 : vector<2x1xf32>, vector<2x1xf32>, vector<2x1xf32>, vector<2x1xf32>, vector<2x1xf32>, vector<2x1xf32>, vector<2x1xf32>, vector<2x1xf32> -> vector<16x1xf32>
    %53 = arith.divf %36, %52 : vector<16x1xf32>
    %54 = vector.broadcast %53 : vector<16x1xf32> to vector<16x32xf32>
    %55 = arith.mulf %54, %0 : vector<16x32xf32>
    %56 = arith.truncf %55 : vector<16x32xf32> to vector<16x32xbf16>
    %c0_13 = arith.constant 0 : index
    %c0_14 = arith.constant 0 : index
    %57 = vector.load %arg7[%c0_13, %c0_14] : memref<32x96xbf16, #tpu.memory_space<vmem>>, vector<32x96xbf16>
    %cst_15 = arith.constant dense<0.000000e+00> : vector<16x96xf32>
    %58 = tpu.matmul %56, %57, %cst_15 {dimension_numbers = #tpu.dot_dimension_numbers<[1], [0], [0], [1], [0, 0, 1, 1], [], []>} : vector<16x32xbf16>, vector<32x96xbf16>, vector<16x96xf32> -> vector<16x96xf32>
    %c0_16 = arith.constant 0 : index
    %c0_17 = arith.constant 0 : index
    %59 = vector.load %arg9[%c0_16, %c0_17] : memref<1x96xf32, #tpu.memory_space<vmem>>, vector<1x96xf32>
    %60 = vector.broadcast %59 : vector<1x96xf32> to vector<16x96xf32>
    %61 = arith.addf %58, %60 : vector<16x96xf32>
    %c0_18 = arith.constant 0 : index
    %c0_19 = arith.constant 0 : index
    %62 = vector.load %arg8[%c0_18, %c0_19] : memref<32x96xbf16, #tpu.memory_space<vmem>>, vector<32x96xbf16>
    %c0_20 = arith.constant 0 : index
    %c0_21 = arith.constant 0 : index
    %63 = vector.load %arg10[%c0_20, %c0_21] : memref<1x96xf32, #tpu.memory_space<vmem>>, vector<1x96xf32>
    %64 = vector.extract_strided_slice %61 {offsets = [0, 0], sizes = [2, 96], strides = [1, 1]} : vector<16x96xf32> to vector<2x96xf32>
    %65 = arith.truncf %1 : vector<2x32xf32> to vector<2x32xbf16>
    %cst_22 = arith.constant dense<0.000000e+00> : vector<2x96xf32>
    %66 = tpu.matmul %65, %62, %cst_22 {dimension_numbers = #tpu.dot_dimension_numbers<[1], [0], [0], [1], [0, 0, 1, 1], [], []>} : vector<2x32xbf16>, vector<32x96xbf16>, vector<2x96xf32> -> vector<2x96xf32>
    %67 = vector.broadcast %63 : vector<1x96xf32> to vector<2x96xf32>
    %68 = arith.addf %66, %67 : vector<2x96xf32>
    %69 = vector.extract_strided_slice %64 {offsets = [0, 0], sizes = [2, 32], strides = [1, 1]} : vector<2x96xf32> to vector<2x32xf32>
    %70 = vector.extract_strided_slice %68 {offsets = [0, 0], sizes = [2, 32], strides = [1, 1]} : vector<2x96xf32> to vector<2x32xf32>
    %71 = arith.addf %69, %70 : vector<2x32xf32>
    %72 = arith.negf %71 : vector<2x32xf32>
    %73 = math.exp %72 : vector<2x32xf32>
    %cst_23 = arith.constant 1.000000e+00 : f32
    %74 = vector.broadcast %cst_23 : f32 to vector<2x32xf32>
    %75 = arith.addf %74, %73 : vector<2x32xf32>
    %76 = arith.divf %74, %75 : vector<2x32xf32>
    %77 = vector.extract_strided_slice %64 {offsets = [0, 32], sizes = [2, 32], strides = [1, 1]} : vector<2x96xf32> to vector<2x32xf32>
    %78 = vector.extract_strided_slice %68 {offsets = [0, 32], sizes = [2, 32], strides = [1, 1]} : vector<2x96xf32> to vector<2x32xf32>
    %79 = arith.addf %77, %78 : vector<2x32xf32>
    %80 = arith.negf %79 : vector<2x32xf32>
    %81 = math.exp %80 : vector<2x32xf32>
    %cst_24 = arith.constant 1.000000e+00 : f32
    %82 = vector.broadcast %cst_24 : f32 to vector<2x32xf32>
    %83 = arith.addf %82, %81 : vector<2x32xf32>
    %84 = arith.divf %82, %83 : vector<2x32xf32>
    %85 = vector.extract_strided_slice %64 {offsets = [0, 64], sizes = [2, 32], strides = [1, 1]} : vector<2x96xf32> to vector<2x32xf32>
    %86 = vector.extract_strided_slice %68 {offsets = [0, 64], sizes = [2, 32], strides = [1, 1]} : vector<2x96xf32> to vector<2x32xf32>
    %87 = arith.mulf %76, %86 : vector<2x32xf32>
    %88 = arith.addf %85, %87 : vector<2x32xf32>
    %89 = math.tanh %88 : vector<2x32xf32>
    %cst_25 = arith.constant 1.000000e+00 : f32
    %90 = vector.broadcast %cst_25 : f32 to vector<2x32xf32>
    %91 = arith.subf %90, %84 : vector<2x32xf32>
    %92 = arith.mulf %91, %89 : vector<2x32xf32>
    %93 = arith.mulf %84, %1 : vector<2x32xf32>
    %94 = arith.addf %92, %93 : vector<2x32xf32>
    %c0_26 = arith.constant 0 : index
    %c0_27 = arith.constant 0 : index
    %95 = vector.load %arg11[%c0_26, %c0_27] : memref<16x32xf32, #tpu.memory_space<vmem>>, vector<2x32xf32>
    tpu.vector_store %arg11[%c0_26, %c0_27], %94 {strides = array<i32>} : memref<16x32xf32, #tpu.memory_space<vmem>>, vector<2x32xf32>,
    %96 = vector.extract_strided_slice %61 {offsets = [2, 0], sizes = [2, 96], strides = [1, 1]} : vector<16x96xf32> to vector<2x96xf32>
    %97 = arith.truncf %94 : vector<2x32xf32> to vector<2x32xbf16>
    %cst_28 = arith.constant dense<0.000000e+00> : vector<2x96xf32>
    %98 = tpu.matmul %97, %62, %cst_28 {dimension_numbers = #tpu.dot_dimension_numbers<[1], [0], [0], [1], [0, 0, 1, 1], [], []>} : vector<2x32xbf16>, vector<32x96xbf16>, vector<2x96xf32> -> vector<2x96xf32>
    %99 = vector.broadcast %63 : vector<1x96xf32> to vector<2x96xf32>
    %100 = arith.addf %98, %99 : vector<2x96xf32>
    %101 = vector.extract_strided_slice %96 {offsets = [0, 0], sizes = [2, 32], strides = [1, 1]} : vector<2x96xf32> to vector<2x32xf32>
    %102 = vector.extract_strided_slice %100 {offsets = [0, 0], sizes = [2, 32], strides = [1, 1]} : vector<2x96xf32> to vector<2x32xf32>
    %103 = arith.addf %101, %102 : vector<2x32xf32>
    %104 = arith.negf %103 : vector<2x32xf32>
    %105 = math.exp %104 : vector<2x32xf32>
    %cst_29 = arith.constant 1.000000e+00 : f32
    %106 = vector.broadcast %cst_29 : f32 to vector<2x32xf32>
    %107 = arith.addf %106, %105 : vector<2x32xf32>
    %108 = arith.divf %106, %107 : vector<2x32xf32>
    %109 = vector.extract_strided_slice %96 {offsets = [0, 32], sizes = [2, 32], strides = [1, 1]} : vector<2x96xf32> to vector<2x32xf32>
    %110 = vector.extract_strided_slice %100 {offsets = [0, 32], sizes = [2, 32], strides = [1, 1]} : vector<2x96xf32> to vector<2x32xf32>
    %111 = arith.addf %109, %110 : vector<2x32xf32>
    %112 = arith.negf %111 : vector<2x32xf32>
    %113 = math.exp %112 : vector<2x32xf32>
    %cst_30 = arith.constant 1.000000e+00 : f32
    %114 = vector.broadcast %cst_30 : f32 to vector<2x32xf32>
    %115 = arith.addf %114, %113 : vector<2x32xf32>
    %116 = arith.divf %114, %115 : vector<2x32xf32>
    %117 = vector.extract_strided_slice %96 {offsets = [0, 64], sizes = [2, 32], strides = [1, 1]} : vector<2x96xf32> to vector<2x32xf32>
    %118 = vector.extract_strided_slice %100 {offsets = [0, 64], sizes = [2, 32], strides = [1, 1]} : vector<2x96xf32> to vector<2x32xf32>
    %119 = arith.mulf %108, %118 : vector<2x32xf32>
    %120 = arith.addf %117, %119 : vector<2x32xf32>
    %121 = math.tanh %120 : vector<2x32xf32>
    %cst_31 = arith.constant 1.000000e+00 : f32
    %122 = vector.broadcast %cst_31 : f32 to vector<2x32xf32>
    %123 = arith.subf %122, %116 : vector<2x32xf32>
    %124 = arith.mulf %123, %121 : vector<2x32xf32>
    %125 = arith.mulf %116, %94 : vector<2x32xf32>
    %126 = arith.addf %124, %125 : vector<2x32xf32>
    %c2 = arith.constant 2 : index
    %c0_32 = arith.constant 0 : index
    %127 = vector.load %arg11[%c2, %c0_32] : memref<16x32xf32, #tpu.memory_space<vmem>>, vector<2x32xf32>
    tpu.vector_store %arg11[%c2, %c0_32], %126 {strides = array<i32>} : memref<16x32xf32, #tpu.memory_space<vmem>>, vector<2x32xf32>,
    %128 = vector.extract_strided_slice %61 {offsets = [4, 0], sizes = [2, 96], strides = [1, 1]} : vector<16x96xf32> to vector<2x96xf32>
    %129 = arith.truncf %126 : vector<2x32xf32> to vector<2x32xbf16>
    %cst_33 = arith.constant dense<0.000000e+00> : vector<2x96xf32>
    %130 = tpu.matmul %129, %62, %cst_33 {dimension_numbers = #tpu.dot_dimension_numbers<[1], [0], [0], [1], [0, 0, 1, 1], [], []>} : vector<2x32xbf16>, vector<32x96xbf16>, vector<2x96xf32> -> vector<2x96xf32>
    %131 = vector.broadcast %63 : vector<1x96xf32> to vector<2x96xf32>
    %132 = arith.addf %130, %131 : vector<2x96xf32>
    %133 = vector.extract_strided_slice %128 {offsets = [0, 0], sizes = [2, 32], strides = [1, 1]} : vector<2x96xf32> to vector<2x32xf32>
    %134 = vector.extract_strided_slice %132 {offsets = [0, 0], sizes = [2, 32], strides = [1, 1]} : vector<2x96xf32> to vector<2x32xf32>
    %135 = arith.addf %133, %134 : vector<2x32xf32>
    %136 = arith.negf %135 : vector<2x32xf32>
    %137 = math.exp %136 : vector<2x32xf32>
    %cst_34 = arith.constant 1.000000e+00 : f32
    %138 = vector.broadcast %cst_34 : f32 to vector<2x32xf32>
    %139 = arith.addf %138, %137 : vector<2x32xf32>
    %140 = arith.divf %138, %139 : vector<2x32xf32>
    %141 = vector.extract_strided_slice %128 {offsets = [0, 32], sizes = [2, 32], strides = [1, 1]} : vector<2x96xf32> to vector<2x32xf32>
    %142 = vector.extract_strided_slice %132 {offsets = [0, 32], sizes = [2, 32], strides = [1, 1]} : vector<2x96xf32> to vector<2x32xf32>
    %143 = arith.addf %141, %142 : vector<2x32xf32>
    %144 = arith.negf %143 : vector<2x32xf32>
    %145 = math.exp %144 : vector<2x32xf32>
    %cst_35 = arith.constant 1.000000e+00 : f32
    %146 = vector.broadcast %cst_35 : f32 to vector<2x32xf32>
    %147 = arith.addf %146, %145 : vector<2x32xf32>
    %148 = arith.divf %146, %147 : vector<2x32xf32>
    %149 = vector.extract_strided_slice %128 {offsets = [0, 64], sizes = [2, 32], strides = [1, 1]} : vector<2x96xf32> to vector<2x32xf32>
    %150 = vector.extract_strided_slice %132 {offsets = [0, 64], sizes = [2, 32], strides = [1, 1]} : vector<2x96xf32> to vector<2x32xf32>
    %151 = arith.mulf %140, %150 : vector<2x32xf32>
    %152 = arith.addf %149, %151 : vector<2x32xf32>
    %153 = math.tanh %152 : vector<2x32xf32>
    %cst_36 = arith.constant 1.000000e+00 : f32
    %154 = vector.broadcast %cst_36 : f32 to vector<2x32xf32>
    %155 = arith.subf %154, %148 : vector<2x32xf32>
    %156 = arith.mulf %155, %153 : vector<2x32xf32>
    %157 = arith.mulf %148, %126 : vector<2x32xf32>
    %158 = arith.addf %156, %157 : vector<2x32xf32>
    %c4 = arith.constant 4 : index
    %c0_37 = arith.constant 0 : index
    %159 = vector.load %arg11[%c4, %c0_37] : memref<16x32xf32, #tpu.memory_space<vmem>>, vector<2x32xf32>
    tpu.vector_store %arg11[%c4, %c0_37], %158 {strides = array<i32>} : memref<16x32xf32, #tpu.memory_space<vmem>>, vector<2x32xf32>,
    %160 = vector.extract_strided_slice %61 {offsets = [6, 0], sizes = [2, 96], strides = [1, 1]} : vector<16x96xf32> to vector<2x96xf32>
    %161 = arith.truncf %158 : vector<2x32xf32> to vector<2x32xbf16>
    %cst_38 = arith.constant dense<0.000000e+00> : vector<2x96xf32>
    %162 = tpu.matmul %161, %62, %cst_38 {dimension_numbers = #tpu.dot_dimension_numbers<[1], [0], [0], [1], [0, 0, 1, 1], [], []>} : vector<2x32xbf16>, vector<32x96xbf16>, vector<2x96xf32> -> vector<2x96xf32>
    %163 = vector.broadcast %63 : vector<1x96xf32> to vector<2x96xf32>
    %164 = arith.addf %162, %163 : vector<2x96xf32>
    %165 = vector.extract_strided_slice %160 {offsets = [0, 0], sizes = [2, 32], strides = [1, 1]} : vector<2x96xf32> to vector<2x32xf32>
    %166 = vector.extract_strided_slice %164 {offsets = [0, 0], sizes = [2, 32], strides = [1, 1]} : vector<2x96xf32> to vector<2x32xf32>
    %167 = arith.addf %165, %166 : vector<2x32xf32>
    %168 = arith.negf %167 : vector<2x32xf32>
    %169 = math.exp %168 : vector<2x32xf32>
    %cst_39 = arith.constant 1.000000e+00 : f32
    %170 = vector.broadcast %cst_39 : f32 to vector<2x32xf32>
    %171 = arith.addf %170, %169 : vector<2x32xf32>
    %172 = arith.divf %170, %171 : vector<2x32xf32>
    %173 = vector.extract_strided_slice %160 {offsets = [0, 32], sizes = [2, 32], strides = [1, 1]} : vector<2x96xf32> to vector<2x32xf32>
    %174 = vector.extract_strided_slice %164 {offsets = [0, 32], sizes = [2, 32], strides = [1, 1]} : vector<2x96xf32> to vector<2x32xf32>
    %175 = arith.addf %173, %174 : vector<2x32xf32>
    %176 = arith.negf %175 : vector<2x32xf32>
    %177 = math.exp %176 : vector<2x32xf32>
    %cst_40 = arith.constant 1.000000e+00 : f32
    %178 = vector.broadcast %cst_40 : f32 to vector<2x32xf32>
    %179 = arith.addf %178, %177 : vector<2x32xf32>
    %180 = arith.divf %178, %179 : vector<2x32xf32>
    %181 = vector.extract_strided_slice %160 {offsets = [0, 64], sizes = [2, 32], strides = [1, 1]} : vector<2x96xf32> to vector<2x32xf32>
    %182 = vector.extract_strided_slice %164 {offsets = [0, 64], sizes = [2, 32], strides = [1, 1]} : vector<2x96xf32> to vector<2x32xf32>
    %183 = arith.mulf %172, %182 : vector<2x32xf32>
    %184 = arith.addf %181, %183 : vector<2x32xf32>
    %185 = math.tanh %184 : vector<2x32xf32>
    %cst_41 = arith.constant 1.000000e+00 : f32
    %186 = vector.broadcast %cst_41 : f32 to vector<2x32xf32>
    %187 = arith.subf %186, %180 : vector<2x32xf32>
    %188 = arith.mulf %187, %185 : vector<2x32xf32>
    %189 = arith.mulf %180, %158 : vector<2x32xf32>
    %190 = arith.addf %188, %189 : vector<2x32xf32>
    %c6 = arith.constant 6 : index
    %c0_42 = arith.constant 0 : index
    %191 = vector.load %arg11[%c6, %c0_42] : memref<16x32xf32, #tpu.memory_space<vmem>>, vector<2x32xf32>
    tpu.vector_store %arg11[%c6, %c0_42], %190 {strides = array<i32>} : memref<16x32xf32, #tpu.memory_space<vmem>>, vector<2x32xf32>,
    %192 = vector.extract_strided_slice %61 {offsets = [8, 0], sizes = [2, 96], strides = [1, 1]} : vector<16x96xf32> to vector<2x96xf32>
    %193 = arith.truncf %190 : vector<2x32xf32> to vector<2x32xbf16>
    %cst_43 = arith.constant dense<0.000000e+00> : vector<2x96xf32>
    %194 = tpu.matmul %193, %62, %cst_43 {dimension_numbers = #tpu.dot_dimension_numbers<[1], [0], [0], [1], [0, 0, 1, 1], [], []>} : vector<2x32xbf16>, vector<32x96xbf16>, vector<2x96xf32> -> vector<2x96xf32>
    %195 = vector.broadcast %63 : vector<1x96xf32> to vector<2x96xf32>
    %196 = arith.addf %194, %195 : vector<2x96xf32>
    %197 = vector.extract_strided_slice %192 {offsets = [0, 0], sizes = [2, 32], strides = [1, 1]} : vector<2x96xf32> to vector<2x32xf32>
    %198 = vector.extract_strided_slice %196 {offsets = [0, 0], sizes = [2, 32], strides = [1, 1]} : vector<2x96xf32> to vector<2x32xf32>
    %199 = arith.addf %197, %198 : vector<2x32xf32>
    %200 = arith.negf %199 : vector<2x32xf32>
    %201 = math.exp %200 : vector<2x32xf32>
    %cst_44 = arith.constant 1.000000e+00 : f32
    %202 = vector.broadcast %cst_44 : f32 to vector<2x32xf32>
    %203 = arith.addf %202, %201 : vector<2x32xf32>
    %204 = arith.divf %202, %203 : vector<2x32xf32>
    %205 = vector.extract_strided_slice %192 {offsets = [0, 32], sizes = [2, 32], strides = [1, 1]} : vector<2x96xf32> to vector<2x32xf32>
    %206 = vector.extract_strided_slice %196 {offsets = [0, 32], sizes = [2, 32], strides = [1, 1]} : vector<2x96xf32> to vector<2x32xf32>
    %207 = arith.addf %205, %206 : vector<2x32xf32>
    %208 = arith.negf %207 : vector<2x32xf32>
    %209 = math.exp %208 : vector<2x32xf32>
    %cst_45 = arith.constant 1.000000e+00 : f32
    %210 = vector.broadcast %cst_45 : f32 to vector<2x32xf32>
    %211 = arith.addf %210, %209 : vector<2x32xf32>
    %212 = arith.divf %210, %211 : vector<2x32xf32>
    %213 = vector.extract_strided_slice %192 {offsets = [0, 64], sizes = [2, 32], strides = [1, 1]} : vector<2x96xf32> to vector<2x32xf32>
    %214 = vector.extract_strided_slice %196 {offsets = [0, 64], sizes = [2, 32], strides = [1, 1]} : vector<2x96xf32> to vector<2x32xf32>
    %215 = arith.mulf %204, %214 : vector<2x32xf32>
    %216 = arith.addf %213, %215 : vector<2x32xf32>
    %217 = math.tanh %216 : vector<2x32xf32>
    %cst_46 = arith.constant 1.000000e+00 : f32
    %218 = vector.broadcast %cst_46 : f32 to vector<2x32xf32>
    %219 = arith.subf %218, %212 : vector<2x32xf32>
    %220 = arith.mulf %219, %217 : vector<2x32xf32>
    %221 = arith.mulf %212, %190 : vector<2x32xf32>
    %222 = arith.addf %220, %221 : vector<2x32xf32>
    %c8 = arith.constant 8 : index
    %c0_47 = arith.constant 0 : index
    %223 = vector.load %arg11[%c8, %c0_47] : memref<16x32xf32, #tpu.memory_space<vmem>>, vector<2x32xf32>
    tpu.vector_store %arg11[%c8, %c0_47], %222 {strides = array<i32>} : memref<16x32xf32, #tpu.memory_space<vmem>>, vector<2x32xf32>,
    %224 = vector.extract_strided_slice %61 {offsets = [10, 0], sizes = [2, 96], strides = [1, 1]} : vector<16x96xf32> to vector<2x96xf32>
    %225 = arith.truncf %222 : vector<2x32xf32> to vector<2x32xbf16>
    %cst_48 = arith.constant dense<0.000000e+00> : vector<2x96xf32>
    %226 = tpu.matmul %225, %62, %cst_48 {dimension_numbers = #tpu.dot_dimension_numbers<[1], [0], [0], [1], [0, 0, 1, 1], [], []>} : vector<2x32xbf16>, vector<32x96xbf16>, vector<2x96xf32> -> vector<2x96xf32>
    %227 = vector.broadcast %63 : vector<1x96xf32> to vector<2x96xf32>
    %228 = arith.addf %226, %227 : vector<2x96xf32>
    %229 = vector.extract_strided_slice %224 {offsets = [0, 0], sizes = [2, 32], strides = [1, 1]} : vector<2x96xf32> to vector<2x32xf32>
    %230 = vector.extract_strided_slice %228 {offsets = [0, 0], sizes = [2, 32], strides = [1, 1]} : vector<2x96xf32> to vector<2x32xf32>
    %231 = arith.addf %229, %230 : vector<2x32xf32>
    %232 = arith.negf %231 : vector<2x32xf32>
    %233 = math.exp %232 : vector<2x32xf32>
    %cst_49 = arith.constant 1.000000e+00 : f32
    %234 = vector.broadcast %cst_49 : f32 to vector<2x32xf32>
    %235 = arith.addf %234, %233 : vector<2x32xf32>
    %236 = arith.divf %234, %235 : vector<2x32xf32>
    %237 = vector.extract_strided_slice %224 {offsets = [0, 32], sizes = [2, 32], strides = [1, 1]} : vector<2x96xf32> to vector<2x32xf32>
    %238 = vector.extract_strided_slice %228 {offsets = [0, 32], sizes = [2, 32], strides = [1, 1]} : vector<2x96xf32> to vector<2x32xf32>
    %239 = arith.addf %237, %238 : vector<2x32xf32>
    %240 = arith.negf %239 : vector<2x32xf32>
    %241 = math.exp %240 : vector<2x32xf32>
    %cst_50 = arith.constant 1.000000e+00 : f32
    %242 = vector.broadcast %cst_50 : f32 to vector<2x32xf32>
    %243 = arith.addf %242, %241 : vector<2x32xf32>
    %244 = arith.divf %242, %243 : vector<2x32xf32>
    %245 = vector.extract_strided_slice %224 {offsets = [0, 64], sizes = [2, 32], strides = [1, 1]} : vector<2x96xf32> to vector<2x32xf32>
    %246 = vector.extract_strided_slice %228 {offsets = [0, 64], sizes = [2, 32], strides = [1, 1]} : vector<2x96xf32> to vector<2x32xf32>
    %247 = arith.mulf %236, %246 : vector<2x32xf32>
    %248 = arith.addf %245, %247 : vector<2x32xf32>
    %249 = math.tanh %248 : vector<2x32xf32>
    %cst_51 = arith.constant 1.000000e+00 : f32
    %250 = vector.broadcast %cst_51 : f32 to vector<2x32xf32>
    %251 = arith.subf %250, %244 : vector<2x32xf32>
    %252 = arith.mulf %251, %249 : vector<2x32xf32>
    %253 = arith.mulf %244, %222 : vector<2x32xf32>
    %254 = arith.addf %252, %253 : vector<2x32xf32>
    %c10 = arith.constant 10 : index
    %c0_52 = arith.constant 0 : index
    %255 = vector.load %arg11[%c10, %c0_52] : memref<16x32xf32, #tpu.memory_space<vmem>>, vector<2x32xf32>
    tpu.vector_store %arg11[%c10, %c0_52], %254 {strides = array<i32>} : memref<16x32xf32, #tpu.memory_space<vmem>>, vector<2x32xf32>,
    %256 = vector.extract_strided_slice %61 {offsets = [12, 0], sizes = [2, 96], strides = [1, 1]} : vector<16x96xf32> to vector<2x96xf32>
    %257 = arith.truncf %254 : vector<2x32xf32> to vector<2x32xbf16>
    %cst_53 = arith.constant dense<0.000000e+00> : vector<2x96xf32>
    %258 = tpu.matmul %257, %62, %cst_53 {dimension_numbers = #tpu.dot_dimension_numbers<[1], [0], [0], [1], [0, 0, 1, 1], [], []>} : vector<2x32xbf16>, vector<32x96xbf16>, vector<2x96xf32> -> vector<2x96xf32>
    %259 = vector.broadcast %63 : vector<1x96xf32> to vector<2x96xf32>
    %260 = arith.addf %258, %259 : vector<2x96xf32>
    %261 = vector.extract_strided_slice %256 {offsets = [0, 0], sizes = [2, 32], strides = [1, 1]} : vector<2x96xf32> to vector<2x32xf32>
    %262 = vector.extract_strided_slice %260 {offsets = [0, 0], sizes = [2, 32], strides = [1, 1]} : vector<2x96xf32> to vector<2x32xf32>
    %263 = arith.addf %261, %262 : vector<2x32xf32>
    %264 = arith.negf %263 : vector<2x32xf32>
    %265 = math.exp %264 : vector<2x32xf32>
    %cst_54 = arith.constant 1.000000e+00 : f32
    %266 = vector.broadcast %cst_54 : f32 to vector<2x32xf32>
    %267 = arith.addf %266, %265 : vector<2x32xf32>
    %268 = arith.divf %266, %267 : vector<2x32xf32>
    %269 = vector.extract_strided_slice %256 {offsets = [0, 32], sizes = [2, 32], strides = [1, 1]} : vector<2x96xf32> to vector<2x32xf32>
    %270 = vector.extract_strided_slice %260 {offsets = [0, 32], sizes = [2, 32], strides = [1, 1]} : vector<2x96xf32> to vector<2x32xf32>
    %271 = arith.addf %269, %270 : vector<2x32xf32>
    %272 = arith.negf %271 : vector<2x32xf32>
    %273 = math.exp %272 : vector<2x32xf32>
    %cst_55 = arith.constant 1.000000e+00 : f32
    %274 = vector.broadcast %cst_55 : f32 to vector<2x32xf32>
    %275 = arith.addf %274, %273 : vector<2x32xf32>
    %276 = arith.divf %274, %275 : vector<2x32xf32>
    %277 = vector.extract_strided_slice %256 {offsets = [0, 64], sizes = [2, 32], strides = [1, 1]} : vector<2x96xf32> to vector<2x32xf32>
    %278 = vector.extract_strided_slice %260 {offsets = [0, 64], sizes = [2, 32], strides = [1, 1]} : vector<2x96xf32> to vector<2x32xf32>
    %279 = arith.mulf %268, %278 : vector<2x32xf32>
    %280 = arith.addf %277, %279 : vector<2x32xf32>
    %281 = math.tanh %280 : vector<2x32xf32>
    %cst_56 = arith.constant 1.000000e+00 : f32
    %282 = vector.broadcast %cst_56 : f32 to vector<2x32xf32>
    %283 = arith.subf %282, %276 : vector<2x32xf32>
    %284 = arith.mulf %283, %281 : vector<2x32xf32>
    %285 = arith.mulf %276, %254 : vector<2x32xf32>
    %286 = arith.addf %284, %285 : vector<2x32xf32>
    %c12 = arith.constant 12 : index
    %c0_57 = arith.constant 0 : index
    %287 = vector.load %arg11[%c12, %c0_57] : memref<16x32xf32, #tpu.memory_space<vmem>>, vector<2x32xf32>
    tpu.vector_store %arg11[%c12, %c0_57], %286 {strides = array<i32>} : memref<16x32xf32, #tpu.memory_space<vmem>>, vector<2x32xf32>,
    %288 = vector.extract_strided_slice %61 {offsets = [14, 0], sizes = [2, 96], strides = [1, 1]} : vector<16x96xf32> to vector<2x96xf32>
    %289 = arith.truncf %286 : vector<2x32xf32> to vector<2x32xbf16>
    %cst_58 = arith.constant dense<0.000000e+00> : vector<2x96xf32>
    %290 = tpu.matmul %289, %62, %cst_58 {dimension_numbers = #tpu.dot_dimension_numbers<[1], [0], [0], [1], [0, 0, 1, 1], [], []>} : vector<2x32xbf16>, vector<32x96xbf16>, vector<2x96xf32> -> vector<2x96xf32>
    %291 = vector.broadcast %63 : vector<1x96xf32> to vector<2x96xf32>
    %292 = arith.addf %290, %291 : vector<2x96xf32>
    %293 = vector.extract_strided_slice %288 {offsets = [0, 0], sizes = [2, 32], strides = [1, 1]} : vector<2x96xf32> to vector<2x32xf32>
    %294 = vector.extract_strided_slice %292 {offsets = [0, 0], sizes = [2, 32], strides = [1, 1]} : vector<2x96xf32> to vector<2x32xf32>
    %295 = arith.addf %293, %294 : vector<2x32xf32>
    %296 = arith.negf %295 : vector<2x32xf32>
    %297 = math.exp %296 : vector<2x32xf32>
    %cst_59 = arith.constant 1.000000e+00 : f32
    %298 = vector.broadcast %cst_59 : f32 to vector<2x32xf32>
    %299 = arith.addf %298, %297 : vector<2x32xf32>
    %300 = arith.divf %298, %299 : vector<2x32xf32>
    %301 = vector.extract_strided_slice %288 {offsets = [0, 32], sizes = [2, 32], strides = [1, 1]} : vector<2x96xf32> to vector<2x32xf32>
    %302 = vector.extract_strided_slice %292 {offsets = [0, 32], sizes = [2, 32], strides = [1, 1]} : vector<2x96xf32> to vector<2x32xf32>
    %303 = arith.addf %301, %302 : vector<2x32xf32>
    %304 = arith.negf %303 : vector<2x32xf32>
    %305 = math.exp %304 : vector<2x32xf32>
    %cst_60 = arith.constant 1.000000e+00 : f32
    %306 = vector.broadcast %cst_60 : f32 to vector<2x32xf32>
    %307 = arith.addf %306, %305 : vector<2x32xf32>
    %308 = arith.divf %306, %307 : vector<2x32xf32>
    %309 = vector.extract_strided_slice %288 {offsets = [0, 64], sizes = [2, 32], strides = [1, 1]} : vector<2x96xf32> to vector<2x32xf32>
    %310 = vector.extract_strided_slice %292 {offsets = [0, 64], sizes = [2, 32], strides = [1, 1]} : vector<2x96xf32> to vector<2x32xf32>
    %311 = arith.mulf %300, %310 : vector<2x32xf32>
    %312 = arith.addf %309, %311 : vector<2x32xf32>
    %313 = math.tanh %312 : vector<2x32xf32>
    %cst_61 = arith.constant 1.000000e+00 : f32
    %314 = vector.broadcast %cst_61 : f32 to vector<2x32xf32>
    %315 = arith.subf %314, %308 : vector<2x32xf32>
    %316 = arith.mulf %315, %313 : vector<2x32xf32>
    %317 = arith.mulf %308, %286 : vector<2x32xf32>
    %318 = arith.addf %316, %317 : vector<2x32xf32>
    %c14 = arith.constant 14 : index
    %c0_62 = arith.constant 0 : index
    %319 = vector.load %arg11[%c14, %c0_62] : memref<16x32xf32, #tpu.memory_space<vmem>>, vector<2x32xf32>
    tpu.vector_store %arg11[%c14, %c0_62], %318 {strides = array<i32>} : memref<16x32xf32, #tpu.memory_space<vmem>>, vector<2x32xf32>,
    %c0_63 = arith.constant 0 : index
    %c0_64 = arith.constant 0 : index
    %320 = vector.load %arg12[%c0_63, %c0_64] : memref<2x32xf32, #tpu.memory_space<vmem>>, vector<2x32xf32>
    tpu.vector_store %arg12[%c0_63, %c0_64], %318 {strides = array<i32>} : memref<2x32xf32, #tpu.memory_space<vmem>>, vector<2x32xf32>,
    return
  }
  func.func @transform_0(%arg0: i32) -> (i32, i32) {
    %c0_i32 = arith.constant 0 : i32
    %c0_i32_0 = arith.constant 0 : i32
    return %arg0, %c0_i32 : i32, i32
  }
  func.func @transform_1(%arg0: i32) -> (i32, i32) {
    %c0_i32 = arith.constant 0 : i32
    %c0_i32_0 = arith.constant 0 : i32
    return %arg0, %c0_i32 : i32, i32
  }
  func.func @transform_2(%arg0: i32) -> (i32, i32) {
    %c0_i32 = arith.constant 0 : i32
    %c0_i32_0 = arith.constant 0 : i32
    %c0_i32_1 = arith.constant 0 : i32
    return %c0_i32, %c0_i32_0 : i32, i32
  }
  func.func @transform_3(%arg0: i32) -> (i32, i32) {
    %c0_i32 = arith.constant 0 : i32
    %c0_i32_0 = arith.constant 0 : i32
    %c0_i32_1 = arith.constant 0 : i32
    return %c0_i32, %c0_i32_0 : i32, i32
  }
  func.func @transform_4(%arg0: i32) -> (i32, i32) {
    %c0_i32 = arith.constant 0 : i32
    %c0_i32_0 = arith.constant 0 : i32
    %c0_i32_1 = arith.constant 0 : i32
    return %c0_i32, %c0_i32_0 : i32, i32
  }
  func.func @transform_5(%arg0: i32) -> (i32, i32) {
    %c0_i32 = arith.constant 0 : i32
    %c0_i32_0 = arith.constant 0 : i32
    %c0_i32_1 = arith.constant 0 : i32
    return %c0_i32, %c0_i32_0 : i32, i32
  }
  func.func @transform_6(%arg0: i32) -> (i32, i32) {
    %c0_i32 = arith.constant 0 : i32
    %c0_i32_0 = arith.constant 0 : i32
    %c0_i32_1 = arith.constant 0 : i32
    return %c0_i32, %c0_i32_0 : i32, i32
  }
  func.func @transform_7(%arg0: i32) -> (i32, i32) {
    %c0_i32 = arith.constant 0 : i32
    %c0_i32_0 = arith.constant 0 : i32
    %c0_i32_1 = arith.constant 0 : i32
    return %c0_i32, %c0_i32_0 : i32, i32
  }
  func.func @transform_8(%arg0: i32) -> (i32, i32) {
    %c0_i32 = arith.constant 0 : i32
    %c0_i32_0 = arith.constant 0 : i32
    %c0_i32_1 = arith.constant 0 : i32
    return %c0_i32, %c0_i32_0 : i32, i32
  }
  func.func @transform_9(%arg0: i32) -> (i32, i32) {
    %c0_i32 = arith.constant 0 : i32
    %c0_i32_0 = arith.constant 0 : i32
    %c0_i32_1 = arith.constant 0 : i32
    return %c0_i32, %c0_i32_0 : i32, i32
  }
  func.func @transform_10(%arg0: i32) -> (i32, i32) {
    %c0_i32 = arith.constant 0 : i32
    %c0_i32_0 = arith.constant 0 : i32
    return %arg0, %c0_i32 : i32, i32
  }
  func.func @transform_11(%arg0: i32) -> (i32, i32) {
    %c0_i32 = arith.constant 0 : i32
    %c0_i32_0 = arith.constant 0 : i32
    return %arg0, %c0_i32 : i32, i32
  }
}

</mosaic_0001>

<bundles_post_ra>
// kernel: decoder_attn_forward.1
= control target key start
LH: loop header
LB: loop body
LE: loop exit
PB: predicated region body
PF: predicated region fallthrough
CT: control target
= control target key end

     0   :  { %17 = vsyncpa [#allocation3], 0  ;;  %s1827_s0 = inlined_call_operand.vmem [shape: f32[16,32], index: 0, kind: input, shape index: {}]   ;;  %s1828_s1 = inlined_call_operand.hbm [shape: f32[2,32], index: 1, kind: input, shape index: {}]   ;;  %s1829_s2 = inlined_call_operand.vmem [shape: bf16[32,32], index: 2, kind: input, shape index: {}]   ;;  %s1830_s3 = inlined_call_operand.vmem [shape: bf16[32,32], index: 3, kind: input, shape index: {}]   ;;  %s1831_s4 = inlined_call_operand.hbm [shape: f32[1,32], index: 4, kind: input, shape index: {}]   ;;  %s1832_s5 = inlined_call_operand.hbm [shape: f32[1,32], index: 5, kind: input, shape index: {}]   ;;  %s1833_s6 = inlined_call_operand.vmem [shape: bf16[32,96], index: 6, kind: input, shape index: {}]   ;;  %s1834_s7 = inlined_call_operand.hbm [shape: bf16[32,96], index: 7, kind: input, shape index: {}]   ;;  %s1835_s8 = inlined_call_operand.vmem [shape: f32[1,96], index: 8, kind: input, shape index: {}]   ;;  %s1836_s9 = inlined_call_operand.hbm [shape: f32[1,96], index: 9, kind: input, shape index: {}]   ;;  %s1837_s10 = inlined_call_operand.vmem [shape: f32[16,32], index: 10, kind: output, shape index: {0}]   ;;  %s1838_s11 = inlined_call_operand.hbm [shape: f32[2,32], index: 11, kind: output, shape index: {1}]  }
   0x1   :  { %18 = vsyncpa [#allocation6], 0 }
   0x2   :  { %19 = vsyncpa [#allocation9], 0 }
   0x3   :  { %20 = vsyncpa [#allocation4], 0  ;;  %s1474_s17 = smov [#allocation5]   ;;  %s1475_s19 = smov [#allocation8]  }
   0x4   :  { %s43_s18 = sshll.u32 %s1474_s17, 4  ;;  %s64_s20 = sshll.u32 %s1475_s19, 4  ;;  %s44_s18 = int_to_ptr.vmem [resolvable:$true] %s43_s18  ;;  %s65_s20 = int_to_ptr.vmem [resolvable:$true] %s64_s20 }
   0x5   :  { %s1354_s21 = scalar_lea.vmem %s44_s18, 16  ;;  %s1358_s22 = scalar_lea.vmem %s44_s18, 32 }
   0x6   :  { %p1355_p0 = scmp.ne.s32.totalorder %s44_s18, %s1354_s21  ;;  %p1359_p1 = scmp.lt.s32.totalorder %s44_s18, %s44_s18 }
   0x7   :  { %p1360_p2 = scmp.lt.s32.totalorder %s1358_s22, %s1354_s21 }
   0x9   :  { %p1361_p3 = por %p1360_p2, %p1359_p1 }
   0xb   :  { %p1362_p4 = pnand %p1361_p3, %p1355_p0 }
   0xd   :  { %1365 = shalt.err (!%p1362_p4)
}
   0xe   :  { %46 = dma.hbm_to_vmem [thread:$0]  %s1831_s4, 16, %s44_s18, [#allocation6]  }
   0xf   :  { %s1374_s25 = scalar_lea.vmem %s65_s20, 256  ;;  %p1379_p6 = scmp.lt.s32.totalorder %s65_s20, %s65_s20 }
  0x10   :  { %p1375_p5 = scmp.ne.s32.totalorder %s65_s20, %s1374_s25  ;;  %p1380_p7 = scmp.lt.s32.totalorder %s1374_s25, %s1374_s25 }
  0x12   :  { %p1381_p8 = por %p1380_p7, %p1379_p6 }
  0x14   :  { %p1382_p9 = pnand %p1381_p8, %p1375_p5 }
  0x16   :  { %1385 = shalt.err (!%p1382_p9)
}
  0x17   :  { %s1476_s26 = smov 64   ;;  %s1477_s27 = smov 4  }
  0x18   :  { %70 = dma.hbm_to_vmem [thread:$0]  %s1834_s7, 256, %s65_s20, [#allocation9], %s1476_s26, %s1476_s26, %s1477_s27  }
  0x19   :  { %s1478_s30 = smov [#allocation2]   ;;  %s1479_s13 = smov [#allocation7]  }
  0x1a   :  { %s29_s12 = sshll.u32 %s1478_s30, 4  ;;  %s53_s14 = sshll.u32 %s1479_s13, 4  ;;  %s30_s12 = int_to_ptr.vmem [resolvable:$true] %s29_s12  ;;  %s54_s14 = int_to_ptr.vmem [resolvable:$true] %s53_s14 }
  0x1b   :  { %s1394_s4 = scalar_lea.vmem %s30_s12, 32  ;;  %p1399_p11 = scmp.lt.s32.totalorder %s30_s12, %s30_s12 }
  0x1c   :  { %p1395_p10 = scmp.ne.s32.totalorder %s30_s12, %s1394_s4  ;;  %p1400_p12 = scmp.lt.s32.totalorder %s1394_s4, %s1394_s4 }
  0x1e   :  { %p1401_p13 = por %p1400_p12, %p1399_p11 }
  0x20   :  { %p1402_p0 = pnand %p1401_p13, %p1395_p10 }
  0x22   :  { %1405 = shalt.err (!%p1402_p0)
}
  0x23   :  { %32 = dma.hbm_to_vmem [thread:$0]  %s1828_s1, 32, %s30_s12, [#allocation3]  }
  0x24   :  { %s1414_s17 = scalar_lea.vmem %s54_s14, 16  ;;  %s1418_s7 = scalar_lea.vmem %s54_s14, 32 }
  0x25   :  { %p1415_p1 = scmp.ne.s32.totalorder %s54_s14, %s1414_s17  ;;  %p1419_p2 = scmp.lt.s32.totalorder %s54_s14, %s54_s14 }
  0x26   :  { %p1420_p3 = scmp.lt.s32.totalorder %s1418_s7, %s1414_s17 }
  0x28   :  { %p1421_p4 = por %p1420_p3, %p1419_p2 }
  0x2a   :  { %p1422_p5 = pnand %p1421_p4, %p1415_p1 }
  0x2c   :  { %1425 = shalt.err (!%p1422_p5)
}
  0x2d   :  { %56 = dma.hbm_to_vmem [thread:$0]  %s1832_s5, 16, %s54_s14, [#allocation6]  }
  0x2e   :  { %s1480_s20 = smov [#allocation10]  }
  0x2f   :  { %s79_s21 = sshll.u32 %s1480_s20, 4  ;;  %s80_s21 = int_to_ptr.vmem [resolvable:$true] %s79_s21 }
  0x30   :  { %s1434_s22 = scalar_lea.vmem %s80_s21, 16  ;;  %s1438_s23 = scalar_lea.vmem %s80_s21, 32 }
  0x31   :  { %p1435_p6 = scmp.ne.s32.totalorder %s80_s21, %s1434_s22  ;;  %p1439_p7 = scmp.lt.s32.totalorder %s80_s21, %s80_s21 }
  0x32   :  { %p1440_p8 = scmp.lt.s32.totalorder %s1438_s23, %s1434_s22 }
  0x34   :  { %p1441_p9 = por %p1440_p8, %p1439_p7 }
  0x36   :  { %p1442_p10 = pnand %p1441_p9, %p1435_p6 }
  0x38   :  { %1445 = shalt.err (!%p1442_p10)
}
  0x39   :  { %82 = dma.hbm_to_vmem [thread:$0]  %s1836_s9, 16, %s80_s21, [#allocation9]  }
  0x3a   :  { %1466 = dma.done.wait [#allocation3], 32  }
  0x3b   :  { %1467 = vsyncadd [#allocation3], 4294967264 }
  0x3c   :  { %1468 = dma.done.wait [#allocation6], 32  }
  0x3d   :  { %1469 = vsyncadd [#allocation6], 4294967264 }
  0x3e   :  { %1470 = dma.done.wait [#allocation9], 272  }
  0x3f   :  { %1471 = vsyncadd [#allocation9], 4294967024  ;;  %v1481_v0 = vmov 0.0   ;;  %vm1482_vm0 = vmmov 0   ;;  %v1280_v1 = vld [vmem:[%s1830_s3 + $0x8] sm:$0xff]   ;;  %v1282_v3 = vld [vmem:[%s1830_s3] sm:$0xff]  }
  0x40   :  { %1177 = vmatprep.subr.bf16.mxu0 %v1481_v0  ;;  %1185 = vmatprep.subr.bf16.mxu1 %v1481_v0  ;;  %v1281_v2 = vld [vmem:[%s1829_s2 + $0x8] sm:$0xff]   ;;  %v1283_v4 = vld [vmem:[%s1829_s2] sm:$0xff]   ;;  %vm131_vm1 = vcmask 261120   ;;  %vm182_vm2 = vcmask 1041408   ;;  %vm184_vm3 = vcmask 1043456   ;;  %vm186_vm4 = vcmask 1045504  }
  0x41   :  { %1181 = vmatprep.mubr.msk.bf16.mxu0 %vm1482_vm0, %v1481_v0  ;;  %1189 = vmatprep.mubr.msk.bf16.mxu1 %vm1482_vm0, %v1481_v0  ;;  %v1584_v5 = vld [vmem:[#allocation2] sm:$0x3]  ;;  %v1594_v7 = vld [vmem:[%s1827_s0 + $0x8] sm:$0xff]  ;;  %v1113_v10 = vld [vmem:[#allocation5] ss:$0 sm:$0xff]  ;;  %v1483_v35 = vmov 0  }
  0x42   :  { %1178 = vmatpush3.bf16.msra.mxu0 %v1280_v1  ;;  %1186 = vmatpush3.bf16.msra.mxu1 %v1281_v2  ;;  %v1589_v6 = vld [vmem:[%s1827_s0] sm:$0xff]  ;;  %v107_v8 = vpack.c.bf16 %v1584_v5, %v1584_v5  ;;  %v1613_v36 = vld [vmem:[#allocation8 + $0x8] sm:$0xff]   ;;  %s1485_s7 = smov 32   ;;  %vm592_vm5 = vcmask 257026   ;;  %vm760_vm6 = vcmask 261126   ;;  %vm509_vm7 = vcmask 254976  }
  0x43   :  { %1179 = vmatprep.subr.bf16.mxu0 %v1481_v0  ;;  %1187 = vmatprep.subr.bf16.mxu1 %v1481_v0  ;;  %v102_v9 = vpack.c.bf16 %v1594_v7, %v1589_v6  ;;  %v1120_v28 = vld [vmem:[#allocation7] ss:$0 sm:$0xff]  ;;  %v1616_v37 = vld [vmem:[#allocation8] sm:$0xff]   ;;  %vm676_vm8 = vcmask 259076   ;;  %s1486_s27 = smov [#allocation11]  }
  0x44   :  { %1278 = vset.pattern.permute.xlu1 %v1483_v35  ;;  %1279 = vset.pattern.permute.xlu0 %v1483_v35  ;;  %s1100_s28 = sshll.u32 %s1486_s27, 4  ;;  %s1101_s28 = int_to_ptr.vmem [resolvable:$true] %s1100_s28 }
  0x45   :  { %s1446_s12 = scalar_lea.vmem %s1101_s28, 32  ;;  %p1451_p12 = scmp.lt.s32.totalorder %s1101_s28, %s1101_s28 }
  0x46   :  { %1180 = vmatpush3.bf16.msra.mxu0 %v1282_v3  ;;  %1188 = vmatpush3.bf16.msra.mxu1 %v1283_v4  ;;  %p1447_p11 = scmp.ne.s32.totalorder %s1101_s28, %s1446_s12  ;;  %p1452_p13 = scmp.lt.s32.totalorder %s1446_s12, %s1446_s12 }
  0x47   :  { %1193 = vmatprep.subr.bf16.mxu0 %v1481_v0  ;;  %1201 = vmatprep.subr.bf16.mxu1 %v1481_v0 }
  0x48   :  { %p1453_p0 = por %p1452_p13, %p1451_p12 }
  0x49   :  { %1182 = vmatmul.mubr.msk.bf16.vlgmr.msra.gmra.mxu0 %vm131_vm1, %v107_v8  ;;  %1190 = vmatmul.mubr.msk.bf16.vlgmr.msra.gmra.mxu1 %vm131_vm1, %v102_v9 }
  0x4a   :  { %1197 = vmatprep.mubr.msk.bf16.mxu0 %vm1482_vm0, %v1481_v0  ;;  %1205 = vmatprep.mubr.msk.bf16.mxu1 %vm1482_vm0, %v1481_v0  ;;  %p1454_p1 = pnand %p1453_p0, %p1447_p11 }
  0x4b   :  { %1202 = vmatpush3.bf16.msra.mxu1 %v1613_v36 }
  0x4c   :  { %1203 = vmatprep.subr.bf16.mxu1 %v1481_v0 }
  0x4f   :  { %1204 = vmatpush3.bf16.msra.mxu1 %v1616_v37 }
  0x50   :  { %1217 = vmatprep.subr.bf16.mxu1 %v1481_v0 }
  0x52   :  { %1206 = vmatmul.mubr.msk.bf16.vlgmr.msra.gmra.mxu1 %vm131_vm1, %v107_v8 }
  0x53   :  { %1218 = vmatpush3.bf16.msra.mxu1 %v1613_v36  ;;  %1221 = vmatprep.mubr.msk.bf16.mxu1 %vm1482_vm0, %v1481_v0 }
  0x54   :  { %1219 = vmatprep.subr.bf16.mxu1 %v1481_v0 }
  0x57   :  { %1220 = vmatpush3.bf16.msra.mxu1 %v1616_v37 }
  0x58   :  { %1233 = vmatprep.subr.bf16.mxu1 %v1481_v0 }
 0x109   :  { %v169_v11 = vpop.f32.mrf.mxu0  ;;  %v237_v13 = vpop.f32.mrf.mxu1 }
 0x10a   :  { %v170_v12 = vadd.f32 %v1113_v10, %v169_v11 }
 0x10b   :  { %v1183_v14 = vpop.f32.mrf.mxu0  ;;  %v1191_v17 = vpop.f32.mrf.mxu1 }
 0x10c   :  { %v176_v15 = vrot.slane %v170_v12, 6  ;;  %v178_v16 = vrot.slane %v170_v12, 4  ;;  %v180_v19 = vrot.slane %v170_v12, 2 }
 0x10d   :  { %v172_v18 = vpop.f32.mrf.mxu0  ;;  %v240_v21 = vpop.f32.mrf.mxu1 }
 0x10e   :  { %v183_v20 = vsel %vm182_vm2, %v170_v12, %v176_v15 }
 0x10f   :  { %v185_v22 = vsel %vm184_vm3, %v183_v20, %v178_v16  ;;  %v1184_v23 = vpop.f32.mrf.mxu0  ;;  %v1192_v25 = vpop.f32.mrf.mxu1 }
 0x110   :  { %v187_v24 = vsel %vm186_vm4, %v185_v22, %v180_v19 }
 0x111   :  { %v238_v26 = vadd.f32 %v237_v13, %v187_v24  ;;  %v241_v27 = vadd.f32 %v240_v21, %v187_v24  ;;  %v1286_v24 = vld [vmem:[%s1833_s6 + $0x8] sm:$0xff]  }
 0x112   :  { %1194 = vmatpush3.bf16.msra.mxu0 %v1286_v24 }
 0x113   :  { %1288 = vtanh.f32 %v238_v26  ;;  %1195 = vmatprep.subr.bf16.mxu0 %v1481_v0 }
 0x114   :  { %1290 = vtanh.f32 %v241_v27  ;;  %v1287_v27 = vld [vmem:[%s1833_s6] sm:$0xff]  }
 0x116   :  { %1196 = vmatpush3.bf16.msra.mxu0 %v1287_v27 }
 0x117   :  { %1209 = vmatprep.subr.bf16.mxu0 %v1481_v0 }
 0x120   :  { %v1289_v29 = vpop.eup %1288 }
 0x121   :  { %v1291_v30 = vpop.eup %1290  ;;  %v253_v31 = vmul.f32 %v1289_v29, %v1120_v28  ;;  %v1642_v29 = vld [vmem:[#allocation10] ss:$0 sm:$0xff] }
 0x122   :  { %v254_v33 = vmul.f32 %v1291_v30, %v1120_v28  ;;  %v469_v30 = vpop.f32.mrf.mxu1 }
 0x123   :  { %v255_v32 = vsel %vm131_vm1, %v253_v31, 0.0  ;;  %v470_v31 = vadd.f32 %v1642_v29, %v469_v30 }
 0x124   :  { %256 = vadd.xlane.f32.xlu0 %v255_v32  ;;  %v258_v34 = vsel %vm131_vm1, %v254_v33, 0.0  ;;  %v1207_v32 = vpop.f32.mrf.mxu1 }
 0x126   :  { %v472_v33 = vpop.f32.mrf.mxu1 }
 0x128   :  { %259 = vadd.xlane.f32.xlu0 %v258_v34  ;;  %v1208_v34 = vpop.f32.mrf.mxu1 }
 0x13e   :  { %483 = vrot.lane.b32.xlu0 %v470_v31, %s1476_s26 }
 0x1ad   :  { %v257_v38 = vpop.xlane.xlu0 %256 }
 0x1ae   :  { %v262_v39 = vrot.slane %v257_v38, 2  ;;  %v265_v41 = vrot.slane %v257_v38, 4  ;;  %v268_v43 = vrot.slane %v257_v38, 6 }
 0x1b0   :  { %v264_v40 = vmax.f32 %v257_v38, %v262_v39 }
 0x1b1   :  { %v260_v44 = vpop.xlane.xlu0 %259 }
 0x1b2   :  { %v267_v42 = vmax.f32 %v264_v40, %v265_v41  ;;  %v273_v47 = vrot.slane %v260_v44, 2  ;;  %v276_v49 = vrot.slane %v260_v44, 4  ;;  %v279_v51 = vrot.slane %v260_v44, 6 }
 0x1b4   :  { %v270_v45 = vmax.f32 %v267_v42, %v268_v43 }
 0x1b6   :  { %v271_v46 = vmax.f32 %v270_v45, %v260_v44 }
 0x1b8   :  { %v275_v48 = vmax.f32 %v271_v46, %v273_v47 }
 0x1ba   :  { %v278_v50 = vmax.f32 %v275_v48, %v276_v49 }
 0x1bc   :  { %v281_v52 = vmax.f32 %v278_v50, %v279_v51  ;;  %v484_v51 = vpop.permute.xlu0 %483 }
 0x1be   :  { %v283_v53 = vrot.slane %v281_v52, 6  ;;  %v285_v54 = vrot.slane %v281_v52, 4  ;;  %v287_v55 = vrot.slane %v281_v52, 2 }
 0x1c0   :  { %v289_v56 = vsel %vm182_vm2, %v281_v52, %v283_v53 }
 0x1c1   :  { %v290_v57 = vsel %vm184_vm3, %v289_v56, %v285_v54 }
 0x1c2   :  { %v291_v58 = vsel %vm186_vm4, %v290_v57, %v287_v55 }
 0x1c3   :  { %v292_v59 = vsub.f32 %v257_v38, %v291_v58  ;;  %v293_v60 = vsub.f32 %v260_v44, %v291_v58 }
 0x1c5   :  { %v294_v61 = vmul.f32 1.442695, %v292_v59  ;;  %v296_v62 = vmul.f32 1.442695, %v293_v60 }
 0x1c7   :  { %1292 = vpow2.f32 %v294_v61 }
 0x1c8   :  { %1294 = vpow2.f32 %v296_v62 }
 0x1d4   :  { %v1293_v63 = vpop.eup %1292 }
 0x1d5   :  { %v299_v1 = vrot.slane %v1293_v63, 2  ;;  %v302_v3 = vrot.slane %v1293_v63, 4  ;;  %v305_v8 = vrot.slane %v1293_v63, 6  ;;  %v1295_v9 = vpop.eup %1294 }
 0x1d6   :  { %v310_v12 = vrot.slane %v1295_v9, 2  ;;  %v313_v14 = vrot.slane %v1295_v9, 4  ;;  %v316_v16 = vrot.slane %v1295_v9, 6 }
 0x1d7   :  { %v301_v2 = vadd.f32 %v1293_v63, %v299_v1 }
 0x1d9   :  { %v304_v4 = vadd.f32 %v302_v3, %v301_v2 }
 0x1db   :  { %v307_v10 = vadd.f32 %v305_v8, %v304_v4 }
 0x1dd   :  { %v308_v11 = vadd.f32 %v1295_v9, %v307_v10 }
 0x1df   :  { %v312_v13 = vadd.f32 %v310_v12, %v308_v11 }
 0x1e1   :  { %v315_v15 = vadd.f32 %v313_v14, %v312_v13 }
 0x1e3   :  { %v318_v17 = vadd.f32 %v316_v16, %v315_v15 }
 0x1e5   :  { %v320_v18 = vrot.slane %v318_v17, 6  ;;  %v322_v19 = vrot.slane %v318_v17, 4  ;;  %v324_v20 = vrot.slane %v318_v17, 2 }
 0x1e7   :  { %v326_v21 = vsel %vm182_vm2, %v318_v17, %v320_v18 }
 0x1e8   :  { %v327_v22 = vsel %vm184_vm3, %v326_v21, %v322_v19 }
 0x1e9   :  { %v328_v23 = vsel %vm186_vm4, %v327_v22, %v324_v20 }
 0x1ea   :  { %1296 = vrcp.f32 %v328_v23 }
 0x1f7   :  { %v1297_v25 = vpop.eup %1296 }
 0x1f8   :  { %v330_v26 = vmul.f32 %v1297_v25, %v1293_v63  ;;  %v331_v28 = vmul.f32 %v1297_v25, %v1295_v9 }
 0x1fa   :  { %334 = vperm.xlu1 %1278, %v330_v26  }
 0x1fe   :  { %339 = vperm.xlu1 %1278, %v331_v28  }
 0x275   :  { %v335_v35 = vpop.permute.xlu1 %334 }
 0x276   :  { %v342_v39 = vmul.f32 %v335_v35, %v1589_v6  ;;  %v1121_v6 = vld [vmem:[%s1835_s8] ss:$0 sm:$0xff]  ;;  %s1484_s8 = smov 96  }
 0x279   :  { %v340_v38 = vpop.permute.xlu1 %339 }
 0x27a   :  { %v343_v40 = vmul.f32 %v340_v38, %v1594_v7 }
 0x27c   :  { %v344_v41 = vpack.c.bf16 %v343_v40, %v342_v39 }
 0x27e   :  { %1198 = vmatmul.mubr.msk.bf16.vlgmr.msra.gmra.mxu0 %vm131_vm1, %v344_v41 }
 0x27f   :  { %1210 = vmatpush3.bf16.msra.mxu0 %v1613_v36  ;;  %1213 = vmatprep.mubr.msk.bf16.mxu0 %vm1482_vm0, %v1481_v0 }
 0x280   :  { %1211 = vmatprep.subr.bf16.mxu0 %v1481_v0 }
 0x283   :  { %1212 = vmatpush3.bf16.msra.mxu0 %v1616_v37 }
 0x284   :  { %1225 = vmatprep.subr.bf16.mxu0 %v1481_v0 }
 0x33e   :  { %v405_v42 = vpop.f32.mrf.mxu0 }
 0x33f   :  { %v1658_v7 = vadd.f32 %v1121_v6, %v405_v42 }
 0x340   :  { %v1199_v43 = vpop.f32.mrf.mxu0 }
 0x341   :  { %v475_v44 = vadd.f32 %v470_v31, %v1658_v7 }
 0x342   :  { %v408_v45 = vpop.f32.mrf.mxu0 }
 0x343   :  { %v1129_v46 = vmul.f32 -1.442695, %v475_v44  ;;  %v1661_v47 = vadd.f32 %v1121_v6, %v408_v45 }
 0x344   :  { %v1200_v48 = vpop.f32.mrf.mxu0 }
 0x345   :  { %1298 = vpow2.f32 %v1129_v46 }
 0x352   :  { %v1299_v49 = vpop.eup %1298 }
 0x353   :  { %v479_v50 = vadd.f32 1.0, %v1299_v49 }
 0x355   :  { %1300 = vrcp.f32 %v479_v50 }
 0x362   :  { %v1301_v52 = vpop.eup %1300 }
 0x363   :  { %v486_v53 = vmul.f32 %v1301_v52, %v484_v51  ;;  %v493_v58 = vsub.f32 1.0, %v1301_v52 }
 0x365   :  { %488 = vrot.lane.b32.xlu1 %v486_v53, %s1476_s26 }
 0x3d7   :  { %v489_v54 = vpop.permute.xlu1 %488 }
 0x3d8   :  { %v491_v55 = vadd.f32 %v489_v54, %v1658_v7 }
 0x3da   :  { %1302 = vtanh.f32 %v491_v55 }
 0x3e7   :  { %v1303_v56 = vpop.eup %1302 }
 0x3e8   :  { %495 = vrot.lane.b32.xlu1 %v1303_v56, %s1484_s8 }
 0x3ec   :  { %500 = vrot.lane.b32.xlu1 %v1584_v5, %s1485_s7 }
 0x45a   :  { %v496_v57 = vpop.permute.xlu1 %495 }
 0x45b   :  { %v498_v60 = vmul.f32 %v496_v57, %v493_v58 }
 0x45e   :  { %v501_v59 = vpop.permute.xlu1 %500 }
 0x45f   :  { %v503_v61 = vmul.f32 %v1301_v52, %v501_v59 }
 0x461   :  { %v1667_v62 = vadd.f32 %v503_v61, %v498_v60 }
 0x463   :  { %v511_v63 = vpack.c.bf16 %v1667_v62, %v1667_v62  ;;  %v584_v21 = vrot.slane %v1667_v62, 6 }
 0x465   :  { %513 = vrot.lane.b32.xlu1 %v511_v63, %s1484_s8 }
 0x4d7   :  { %v514_v1 = vpop.permute.xlu1 %513 }
 0x4d8   :  { %1214 = vmatmul.mubr.msk.bf16.vlgmr.msra.gmra.mxu0 %vm131_vm1, %v514_v1 }
 0x4d9   :  { %1226 = vmatpush3.bf16.msra.mxu0 %v1613_v36  ;;  %1229 = vmatprep.mubr.msk.bf16.mxu0 %vm1482_vm0, %v1481_v0 }
 0x4da   :  { %1227 = vmatprep.subr.bf16.mxu0 %v1481_v0 }
 0x4dd   :  { %1228 = vmatpush3.bf16.msra.mxu0 %v1616_v37 }
 0x4de   :  { %1241 = vmatprep.subr.bf16.mxu0 %v1481_v0 }
 0x598   :  { %v552_v5 = vpop.f32.mrf.mxu0 }
 0x599   :  { %v553_v2 = vadd.f32 %v1642_v29, %v552_v5 }
 0x59a   :  { %v1215_v3 = vpop.f32.mrf.mxu0 }
 0x59b   :  { %v559_v4 = vrot.slane %v553_v2, 6 }
 0x59c   :  { %v555_v8 = vpop.f32.mrf.mxu0 }
 0x59d   :  { %568 = vrot.lane.b32.xlu1 %v559_v4, %s1476_s26  ;;  %v561_v10 = vadd.f32 %v559_v4, %v1658_v7 }
 0x59e   :  { %v1216_v9 = vpop.f32.mrf.mxu0 }
 0x59f   :  { %v1131_v11 = vmul.f32 -1.442695, %v561_v10 }
 0x5a1   :  { %1304 = vpow2.f32 %v1131_v11 }
 0x5ae   :  { %v1305_v12 = vpop.eup %1304 }
 0x5af   :  { %v565_v13 = vadd.f32 1.0, %v1305_v12 }
 0x5b1   :  { %1306 = vrcp.f32 %v565_v13 }
 0x5be   :  { %v1307_v14 = vpop.eup %1306 }
 0x5bf   :  { %v578_v20 = vsub.f32 1.0, %v1307_v14  ;;  %v586_v23 = vmul.f32 %v1307_v14, %v584_v21 }
 0x60f   :  { %v569_v15 = vpop.permute.xlu1 %568 }
 0x610   :  { %v571_v16 = vmul.f32 %v1307_v14, %v569_v15 }
 0x612   :  { %573 = vrot.lane.b32.xlu1 %v571_v16, %s1476_s26 }
 0x684   :  { %v574_v17 = vpop.permute.xlu1 %573 }
 0x685   :  { %v576_v18 = vadd.f32 %v574_v17, %v1658_v7 }
 0x687   :  { %1308 = vtanh.f32 %v576_v18 }
 0x694   :  { %v1309_v19 = vpop.eup %1308 }
 0x695   :  { %580 = vrot.lane.b32.xlu0 %v1309_v19, %s1484_s8 }
 0x707   :  { %v581_v22 = vpop.permute.xlu0 %580 }
 0x708   :  { %v583_v24 = vmul.f32 %v581_v22, %v578_v20 }
 0x70a   :  { %v1686_v25 = vadd.f32 %v586_v23, %v583_v24 }
 0x70c   :  { %v594_v26 = vpack.c.bf16 %v1686_v25, %v1686_v25  ;;  %v668_v49 = vrot.slane %v1686_v25, 6 }
 0x70e   :  { %v596_v27 = vrot.slane %v594_v26, 1 }
 0x710   :  { %597 = vrot.lane.b32.xlu1 %v596_v27, %s1484_s8 }
 0x782   :  { %v598_v28 = vpop.permute.xlu1 %597 }
 0x783   :  { %1222 = vmatmul.mubr.msk.bf16.vlgmr.msra.gmra.mxu1 %vm131_vm1, %v598_v28 }
 0x784   :  { %1234 = vmatpush3.bf16.msra.mxu1 %v1613_v36  ;;  %1237 = vmatprep.mubr.msk.bf16.mxu1 %vm1482_vm0, %v1481_v0 }
 0x785   :  { %1235 = vmatprep.subr.bf16.mxu1 %v1481_v0 }
 0x788   :  { %1236 = vmatpush3.bf16.msra.mxu1 %v1616_v37 }
 0x789   :  { %1249 = vmatprep.subr.bf16.mxu1 %v1481_v0 }
 0x843   :  { %v636_v30 = vpop.f32.mrf.mxu1 }
 0x844   :  { %v637_v31 = vadd.f32 %v1642_v29, %v636_v30 }
 0x845   :  { %v1223_v32 = vpop.f32.mrf.mxu1 }
 0x846   :  { %v643_v33 = vrot.slane %v637_v31, 4 }
 0x847   :  { %v639_v34 = vpop.f32.mrf.mxu1 }
 0x848   :  { %652 = vrot.lane.b32.xlu0 %v643_v33, %s1476_s26  ;;  %v645_v38 = vadd.f32 %v643_v33, %v1658_v7 }
 0x849   :  { %v1224_v35 = vpop.f32.mrf.mxu1 }
 0x84a   :  { %v1133_v39 = vmul.f32 -1.442695, %v645_v38 }
 0x84c   :  { %1310 = vpow2.f32 %v1133_v39 }
 0x859   :  { %v1311_v40 = vpop.eup %1310 }
 0x85a   :  { %v649_v41 = vadd.f32 1.0, %v1311_v40 }
 0x85c   :  { %1312 = vrcp.f32 %v649_v41 }
 0x869   :  { %v1313_v6 = vpop.eup %1312 }
 0x86a   :  { %v662_v48 = vsub.f32 1.0, %v1313_v6  ;;  %v670_v51 = vmul.f32 %v1313_v6, %v668_v49 }
 0x8ba   :  { %v653_v42 = vpop.permute.xlu0 %652 }
 0x8bb   :  { %v655_v43 = vmul.f32 %v1313_v6, %v653_v42 }
 0x8bd   :  { %657 = vrot.lane.b32.xlu1 %v655_v43, %s1476_s26 }
 0x92f   :  { %v658_v44 = vpop.permute.xlu1 %657 }
 0x930   :  { %v660_v45 = vadd.f32 %v658_v44, %v1658_v7 }
 0x932   :  { %1314 = vtanh.f32 %v660_v45 }
 0x93f   :  { %v1315_v46 = vpop.eup %1314 }
 0x940   :  { %664 = vrot.lane.b32.xlu0 %v1315_v46, %s1484_s8 }
 0x9b2   :  { %v665_v50 = vpop.permute.xlu0 %664 }
 0x9b3   :  { %v667_v52 = vmul.f32 %v665_v50, %v662_v48 }
 0x9b5   :  { %v1705_v53 = vadd.f32 %v670_v51, %v667_v52 }
 0x9b7   :  { %v678_v54 = vpack.c.bf16 %v1705_v53, %v1705_v53  ;;  %v752_v14 = vrot.slane %v1705_v53, 6 }
 0x9b9   :  { %v680_v55 = vrot.slane %v678_v54, 2 }
 0x9bb   :  { %681 = vrot.lane.b32.xlu1 %v680_v55, %s1484_s8 }
 0xa2d   :  { %v682_v56 = vpop.permute.xlu1 %681 }
 0xa2e   :  { %1230 = vmatmul.mubr.msk.bf16.vlgmr.msra.gmra.mxu0 %vm131_vm1, %v682_v56 }
 0xa2f   :  { %1242 = vmatpush3.bf16.msra.mxu0 %v1613_v36  ;;  %1245 = vmatprep.mubr.msk.bf16.mxu0 %vm1482_vm0, %v1481_v0 }
 0xa30   :  { %1243 = vmatprep.subr.bf16.mxu0 %v1481_v0 }
 0xa33   :  { %1244 = vmatpush3.bf16.msra.mxu0 %v1616_v37 }
 0xa34   :  { %1257 = vmatprep.subr.bf16.mxu0 %v1481_v0 }
 0xaee   :  { %v720_v57 = vpop.f32.mrf.mxu0 }
 0xaef   :  { %v721_v58 = vadd.f32 %v1642_v29, %v720_v57 }
 0xaf0   :  { %v1231_v59 = vpop.f32.mrf.mxu0 }
 0xaf1   :  { %v727_v60 = vrot.slane %v721_v58, 2 }
 0xaf2   :  { %v723_v61 = vpop.f32.mrf.mxu0 }
 0xaf3   :  { %736 = vrot.lane.b32.xlu0 %v727_v60, %s1476_s26  ;;  %v729_v1 = vadd.f32 %v727_v60, %v1658_v7 }
 0xaf4   :  { %v1232_v63 = vpop.f32.mrf.mxu0 }
 0xaf5   :  { %v1135_v5 = vmul.f32 -1.442695, %v729_v1 }
 0xaf7   :  { %1316 = vpow2.f32 %v1135_v5 }
 0xb04   :  { %v1317_v2 = vpop.eup %1316 }
 0xb05   :  { %v733_v3 = vadd.f32 1.0, %v1317_v2 }
 0xb07   :  { %1318 = vrcp.f32 %v733_v3 }
 0xb14   :  { %v1319_v4 = vpop.eup %1318 }
 0xb15   :  { %v746_v13 = vsub.f32 1.0, %v1319_v4  ;;  %v754_v16 = vmul.f32 %v1319_v4, %v752_v14 }
 0xb65   :  { %v737_v8 = vpop.permute.xlu0 %736 }
 0xb66   :  { %v739_v9 = vmul.f32 %v1319_v4, %v737_v8 }
 0xb68   :  { %741 = vrot.lane.b32.xlu1 %v739_v9, %s1476_s26 }
 0xbda   :  { %v742_v10 = vpop.permute.xlu1 %741 }
 0xbdb   :  { %v744_v11 = vadd.f32 %v742_v10, %v1658_v7 }
 0xbdd   :  { %1320 = vtanh.f32 %v744_v11 }
 0xbea   :  { %v1321_v12 = vpop.eup %1320 }
 0xbeb   :  { %748 = vrot.lane.b32.xlu0 %v1321_v12, %s1484_s8 }
 0xc5d   :  { %v749_v15 = vpop.permute.xlu0 %748 }
 0xc5e   :  { %v751_v17 = vmul.f32 %v749_v15, %v746_v13 }
 0xc60   :  { %v1724_v18 = vadd.f32 %v754_v16, %v751_v17 }
 0xc62   :  { %v762_v19 = vpack.c.bf16 %v1724_v18, %v1724_v18  ;;  %v834_v41 = vrot.slane %v1724_v18, 6 }
 0xc64   :  { %v764_v20 = vrot.slane %v762_v19, 3 }
 0xc66   :  { %765 = vrot.lane.b32.xlu1 %v764_v20, %s1484_s8 }
 0xcd8   :  { %v766_v21 = vpop.permute.xlu1 %765 }
 0xcd9   :  { %1238 = vmatmul.mubr.msk.bf16.vlgmr.msra.gmra.mxu1 %vm131_vm1, %v766_v21 }
 0xcda   :  { %1250 = vmatpush3.bf16.msra.mxu1 %v1613_v36  ;;  %1253 = vmatprep.mubr.msk.bf16.mxu1 %vm1482_vm0, %v1481_v0 }
 0xcdb   :  { %1251 = vmatprep.subr.bf16.mxu1 %v1481_v0 }
 0xcde   :  { %1252 = vmatpush3.bf16.msra.mxu1 %v1616_v37 }
 0xd99   :  { %v804_v7 = vpop.f32.mrf.mxu1 }
 0xd9a   :  { %v805_v22 = vadd.f32 %v1642_v29, %v804_v7 }
 0xd9b   :  { %v1239_v23 = vpop.f32.mrf.mxu1 }
 0xd9c   :  { %818 = vrot.lane.b32.xlu0 %v805_v22, %s1476_s26  ;;  %v810_v27 = vadd.f32 %v805_v22, %v1661_v47 }
 0xd9d   :  { %v807_v24 = vpop.f32.mrf.mxu1 }
 0xd9e   :  { %v1137_v28 = vmul.f32 -1.442695, %v810_v27 }
 0xd9f   :  { %v1240_v26 = vpop.f32.mrf.mxu1 }
 0xda0   :  { %1322 = vpow2.f32 %v1137_v28 }
 0xdad   :  { %v1323_v30 = vpop.eup %1322 }
 0xdae   :  { %v814_v31 = vadd.f32 1.0, %v1323_v30 }
 0xdb0   :  { %1324 = vrcp.f32 %v814_v31 }
 0xdbd   :  { %v1325_v32 = vpop.eup %1324 }
 0xdbe   :  { %v828_v40 = vsub.f32 1.0, %v1325_v32  ;;  %v836_v42 = vmul.f32 %v1325_v32, %v834_v41 }
 0xe0e   :  { %v819_v33 = vpop.permute.xlu0 %818 }
 0xe0f   :  { %v821_v34 = vmul.f32 %v1325_v32, %v819_v33 }
 0xe11   :  { %823 = vrot.lane.b32.xlu1 %v821_v34, %s1476_s26 }
 0xe83   :  { %v824_v35 = vpop.permute.xlu1 %823 }
 0xe84   :  { %v826_v38 = vadd.f32 %v824_v35, %v1661_v47 }
 0xe86   :  { %1326 = vtanh.f32 %v826_v38 }
 0xe93   :  { %v1327_v39 = vpop.eup %1326 }
 0xe94   :  { %830 = vrot.lane.b32.xlu0 %v1327_v39, %s1484_s8 }
 0xf06   :  { %v831_v6 = vpop.permute.xlu0 %830 }
 0xf07   :  { %v833_v43 = vmul.f32 %v831_v6, %v828_v40 }
 0xf09   :  { %v1742_v44 = vadd.f32 %v836_v42, %v833_v43 }
 0xf0b   :  { %v843_v45 = vpack.c.bf16 %v1742_v44, %v1742_v44  ;;  %v916_v1 = vrot.slane %v1742_v44, 6 }
 0xf0d   :  { %845 = vrot.lane.b32.xlu1 %v843_v45, %s1484_s8 }
 0xf7f   :  { %v846_v46 = vpop.permute.xlu1 %845 }
 0xf80   :  { %1246 = vmatmul.mubr.msk.bf16.vlgmr.msra.gmra.mxu0 %vm131_vm1, %v846_v46 }
 0xf81   :  { %1258 = vmatpush3.bf16.msra.mxu0 %v1613_v36  ;;  %1261 = vmatprep.mubr.msk.bf16.mxu0 %vm1482_vm0, %v1481_v0 }
 0xf82   :  { %1259 = vmatprep.subr.bf16.mxu0 %v1481_v0 }
 0xf85   :  { %1260 = vmatpush3.bf16.msra.mxu0 %v1616_v37 }
0x1040   :  { %v884_v48 = vpop.f32.mrf.mxu0 }
0x1041   :  { %v885_v49 = vadd.f32 %v1642_v29, %v884_v48 }
0x1042   :  { %v1247_v50 = vpop.f32.mrf.mxu0 }
0x1043   :  { %v891_v51 = vrot.slane %v885_v49, 6 }
0x1044   :  { %v887_v52 = vpop.f32.mrf.mxu0 }
0x1045   :  { %900 = vrot.lane.b32.xlu0 %v891_v51, %s1476_s26  ;;  %v893_v55 = vadd.f32 %v891_v51, %v1661_v47 }
0x1046   :  { %v1248_v54 = vpop.f32.mrf.mxu0 }
0x1047   :  { %v1139_v56 = vmul.f32 -1.442695, %v893_v55 }
0x1049   :  { %1328 = vpow2.f32 %v1139_v56 }
0x1056   :  { %v1329_v36 = vpop.eup %1328 }
0x1057   :  { %v897_v57 = vadd.f32 1.0, %v1329_v36 }
0x1059   :  { %1330 = vrcp.f32 %v897_v57 }
0x1066   :  { %v1331_v58 = vpop.eup %1330 }
0x1067   :  { %v910_v63 = vsub.f32 1.0, %v1331_v58  ;;  %v918_v2 = vmul.f32 %v1331_v58, %v916_v1 }
0x10b7   :  { %v901_v0 = vpop.permute.xlu0 %900 }
0x10b8   :  { %v903_v59 = vmul.f32 %v1331_v58, %v901_v0 }
0x10ba   :  { %905 = vrot.lane.b32.xlu1 %v903_v59, %s1476_s26 }
0x112c   :  { %v906_v37 = vpop.permute.xlu1 %905 }
0x112d   :  { %v908_v60 = vadd.f32 %v906_v37, %v1661_v47 }
0x112f   :  { %1332 = vtanh.f32 %v908_v60 }
0x113c   :  { %v1333_v61 = vpop.eup %1332 }
0x113d   :  { %912 = vrot.lane.b32.xlu0 %v1333_v61, %s1484_s8 }
0x11af   :  { %v913_v5 = vpop.permute.xlu0 %912 }
0x11b0   :  { %v915_v3 = vmul.f32 %v913_v5, %v910_v63 }
0x11b2   :  { %v1760_v4 = vadd.f32 %v918_v2, %v915_v3 }
0x11b4   :  { %v925_v8 = vpack.c.bf16 %v1760_v4, %v1760_v4  ;;  %v999_v30 = vrot.slane %v1760_v4, 6 }
0x11b6   :  { %v927_v9 = vrot.slane %v925_v8, 1 }
0x11b8   :  { %928 = vrot.lane.b32.xlu1 %v927_v9, %s1484_s8 }
0x122a   :  { %v929_v10 = vpop.permute.xlu1 %928 }
0x122b   :  { %1254 = vmatmul.mubr.msk.bf16.vlgmr.msra.gmra.mxu1 %vm131_vm1, %v929_v10 }
0x12eb   :  { %v967_v11 = vpop.f32.mrf.mxu1 }
0x12ec   :  { %v968_v12 = vadd.f32 %v1642_v29, %v967_v11 }
0x12ed   :  { %v1255_v13 = vpop.f32.mrf.mxu1 }
0x12ee   :  { %v974_v14 = vrot.slane %v968_v12, 4 }
0x12ef   :  { %v970_v15 = vpop.f32.mrf.mxu1 }
0x12f0   :  { %983 = vrot.lane.b32.xlu0 %v974_v14, %s1476_s26  ;;  %v976_v17 = vadd.f32 %v974_v14, %v1661_v47 }
0x12f1   :  { %v1256_v16 = vpop.f32.mrf.mxu1 }
0x12f2   :  { %v1141_v19 = vmul.f32 -1.442695, %v976_v17 }
0x12f4   :  { %1334 = vpow2.f32 %v1141_v19 }
0x1301   :  { %v1335_v20 = vpop.eup %1334 }
0x1302   :  { %v980_v21 = vadd.f32 1.0, %v1335_v20 }
0x1304   :  { %1336 = vrcp.f32 %v980_v21 }
0x1311   :  { %v1337_v7 = vpop.eup %1336 }
0x1312   :  { %v993_v28 = vsub.f32 1.0, %v1337_v7  ;;  %v1001_v32 = vmul.f32 %v1337_v7, %v999_v30 }
0x1362   :  { %v984_v22 = vpop.permute.xlu0 %983 }
0x1363   :  { %v986_v23 = vmul.f32 %v1337_v7, %v984_v22 }
0x1365   :  { %988 = vrot.lane.b32.xlu1 %v986_v23, %s1476_s26 }
0x13d7   :  { %v989_v24 = vpop.permute.xlu1 %988 }
0x13d8   :  { %v991_v26 = vadd.f32 %v989_v24, %v1661_v47 }
0x13da   :  { %1338 = vtanh.f32 %v991_v26 }
0x13e7   :  { %v1339_v27 = vpop.eup %1338 }
0x13e8   :  { %995 = vrot.lane.b32.xlu0 %v1339_v27, %s1484_s8 }
0x145a   :  { %v996_v31 = vpop.permute.xlu0 %995 }
0x145b   :  { %v998_v33 = vmul.f32 %v996_v31, %v993_v28 }
0x145d   :  { %v1002_v34 = vadd.f32 %v1001_v32, %v998_v33 }
0x145f   :  { %v1008_v35 = vpack.c.bf16 %v1002_v34, %v1002_v34 }
0x1461   :  { %v1010_v38 = vrot.slane %v1008_v35, 2 }
0x1463   :  { %1011 = vrot.lane.b32.xlu1 %v1010_v38, %s1484_s8 }
0x14d5   :  { %v1012_v39 = vpop.permute.xlu1 %1011 }
0x14d6   :  { %1262 = vmatmul.mubr.msk.bf16.vlgmr.msra.gmra.mxu0 %vm131_vm1, %v1012_v39 }
0x1596   :  { %v1050_v40 = vpop.f32.mrf.mxu0 }
0x1597   :  { %v1051_v41 = vadd.f32 %v1642_v29, %v1050_v40 }
0x1598   :  { %v1263_v6 = vpop.f32.mrf.mxu0 }
0x1599   :  { %v1057_v42 = vrot.slane %v1051_v41, 2 }
0x159a   :  { %v1053_v43 = vpop.f32.mrf.mxu0 }
0x159b   :  { %1066 = vrot.lane.b32.xlu0 %v1057_v42, %s1476_s26  ;;  %v1059_v46 = vadd.f32 %v1057_v42, %v1661_v47 }
0x159c   :  { %v1264_v45 = vpop.f32.mrf.mxu0 }
0x159d   :  { %v1143_v48 = vmul.f32 -1.442695, %v1059_v46 }
0x159f   :  { %1340 = vpow2.f32 %v1143_v48 }
0x15ac   :  { %v1341_v49 = vpop.eup %1340 }
0x15ad   :  { %v1063_v50 = vadd.f32 1.0, %v1341_v49 }
0x15af   :  { %1342 = vrcp.f32 %v1063_v50 }
0x15bc   :  { %v1343_v51 = vpop.eup %1342 }
0x160d   :  { %v1067_v52 = vpop.permute.xlu0 %1066 }
0x160e   :  { %v1069_v54 = vmul.f32 %v1343_v51, %v1067_v52 }
0x1610   :  { %1071 = vrot.lane.b32.xlu1 %v1069_v54, %s1476_s26 }
0x1614   :  { %589 = vrot.lane.b32.xlu1 %v1686_v25, %s1484_s8 }
0x1618   :  { %757 = vrot.lane.b32.xlu1 %v1724_v18, %s1484_s8  ;;  %v1082_v18 = vrot.slane %v1002_v34, 6 }
0x161a   :  { %v1084_v58 = vmul.f32 %v1343_v51, %v1082_v18 }
0x1682   :  { %v1072_v29 = vpop.permute.xlu1 %1071 }
0x1683   :  { %v1074_v55 = vadd.f32 %v1072_v29, %v1661_v47  ;;  %v1076_v47 = vsub.f32 1.0, %v1343_v51 }
0x1685   :  { %1344 = vtanh.f32 %v1074_v55 }
0x1686   :  { %v590_v56 = vpop.permute.xlu1 %589 }
0x1687   :  { %593 = vst.msk [vmem:[%s1837_s10] sm:$0xc] %vm592_vm5, %v590_v56 }
0x168a   :  { %v758_v36 = vpop.permute.xlu1 %757 }
0x168b   :  { %761 = vst.msk [vmem:[%s1837_s10] sm:$0xc0] %vm760_vm6, %v758_v36 }
0x1692   :  { %v1345_v25 = vpop.eup %1344 }
0x1693   :  { %1078 = vrot.lane.b32.xlu0 %v1345_v25, %s1484_s8 }
0x1697   :  { %506 = vrot.lane.b32.xlu0 %v1667_v62, %s1484_s8 }
0x169b   :  { %673 = vrot.lane.b32.xlu0 %v1705_v53, %s1484_s8 }
0x169f   :  { %839 = vrot.lane.b32.xlu0 %v1742_v44, %s1484_s8 }
0x16a3   :  { %1004 = vrot.lane.b32.xlu0 %v1002_v34, %s1484_s8 }
0x1705   :  { %v1079_v57 = vpop.permute.xlu0 %1078 }
0x1706   :  { %v1081_v0 = vmul.f32 %v1079_v57, %v1076_v47 }
0x1708   :  { %v1085_v59 = vadd.f32 %v1084_v58, %v1081_v0 }
0x1709   :  { %v507_v37 = vpop.permute.xlu0 %506 }
0x170a   :  { %510 = vst.msk [vmem:[%s1837_s10] sm:$0x3] %vm509_vm7, %v507_v37  ;;  %1087 = vrot.lane.b32.xlu1 %v1085_v59, %s1484_s8 }
0x170d   :  { %v674_v62 = vpop.permute.xlu0 %673 }
0x170e   :  { %677 = vst.msk [vmem:[%s1837_s10] sm:$0x30] %vm676_vm8, %v674_v62  ;;  %921 = vrot.lane.b32.xlu1 %v1760_v4, %s1484_s8 }
0x1711   :  { %v840_v53 = vpop.permute.xlu0 %839 }
0x1712   :  { %842 = vst.msk [vmem:[%s1837_s10 + $0x8] sm:$0x3] %vm509_vm7, %v840_v53 }
0x1715   :  { %v1005_v44 = vpop.permute.xlu0 %1004 }
0x1716   :  { %1007 = vst.msk [vmem:[%s1837_s10 + $0x8] sm:$0x30] %vm676_vm8, %v1005_v44 }
0x177c   :  { %v1088_v60 = vpop.permute.xlu1 %1087 }
0x177d   :  { %1090 = vst.msk [vmem:[%s1837_s10 + $0x8] sm:$0xc0] %vm760_vm6, %v1088_v60  ;;  %1091 = vst.msk [vmem:[#allocation11 - $0x6] sm:$0xc0] %vm760_vm6, %v1088_v60 }
0x177e   :  { %1457 = shalt.err (!%p1454_p1)
}
0x177f   :  { %1103 = dma.vmem_to_hbm [thread:$0]  %s1101_s28, 32, %s1838_s11, [#allocation4]  }
0x1780   :  { %v922_v61 = vpop.permute.xlu1 %921 }
0x1781   :  { %924 = vst.msk [vmem:[%s1837_s10 + $0x8] sm:$0xc] %vm592_vm5, %v922_v61 }
0x1782   :  { %1472 = dma.done.wait [#allocation4], 32  }
0x1783   :  { %1473 = vsyncadd [#allocation4], 4294967264 }
0x1784   :  { %1109 = vsyncpa [#allocation3], 1 }
0x1785   :  { %1110 = vsyncpa [#allocation6], 1 }
0x1786   :  { %1111 = vsyncpa [#allocation9], 1 }
0x1787   :  { %1112 = vsyncpa [#allocation4], 1 }

</bundles_post_ra>
